<compile_context>
chip_gen: v6e
topology: v6e:2x2x1
jax: 0.10.0
libtpu: 0.0.40
codegen_flags: <defaults>
</compile_context>

<pallas_src>
import jax
import jax.numpy as jnp
from jax import lax
from jax.experimental import pallas as pl
from jax.experimental.pallas import tpu as pltpu


def _pick_d_tile(D, row_bytes, budget=4 * 1024 * 1024):
    """Largest divisor of D whose slab (TD rows) stays within ~budget bytes."""
    td = max(1, min(D, budget // max(1, row_bytes)))
    while D % td != 0:
        td -= 1
    return td


def conv_pos_enc(x, size, weight, bias):
    """x: (B, N, C) with N = D*H*W; weight: (C, 1, 3, 3, 3); bias: (C,)."""
    B, N, C = x.shape
    D, H, W = size
    assert N == D * H * W
    WC = W * C

    # (B, N, C) -> (B, D, H, W*C): contiguous reshape, no data movement.
    x_vol = x.reshape(B, D, H, WC)

    # (C,1,3,3,3) -> (3,3,3,C) -> (27, C), tap order k = kd*9 + kh*3 + kw,
    # then tiled over W so it broadcasts directly against the (H, W*C) lanes.
    w_taps = jnp.transpose(weight[:, 0], (1, 2, 3, 0)).reshape(27, C)
    w_taps = jnp.tile(w_taps, (1, W)).astype(jnp.float32)       # (27, W*C)
    b_row = jnp.tile(bias.reshape(1, C), (1, W)).astype(jnp.float32)  # (1, W*C)

    TD = _pick_d_tile(D, H * WC * x.dtype.itemsize)
    n_d = D // TD

    def kernel(xm_ref, xp_ref, xn_ref, w_ref, b_ref, o_ref, ext_ref):
        d = pl.program_id(1)
        is_first = d == 0
        is_last = d == pl.num_programs(1) - 1

        # Extended slab in VMEM (f32, cast once): [prev halo ; slab ; next halo].
        ext_ref[pl.ds(1, TD), :, :] = xm_ref[...].astype(jnp.float32)
        prev = xp_ref[0, :, :].astype(jnp.float32)
        nxt = xn_ref[0, :, :].astype(jnp.float32)
        ext_ref[0, :, :] = jnp.where(is_first, 0.0, prev)       # zero pad at d = -1
        ext_ref[TD + 1, :, :] = jnp.where(is_last, 0.0, nxt)    # zero pad at d = D

        # Hoisted once per grid step (not re-emitted inside the depth loop).
        w_rows = [w_ref[pl.ds(k, 1), :] for k in range(27)]     # each (1, WC)
        bias_row = b_ref[...]                                   # (1, WC)
        lane = lax.broadcasted_iota(jnp.int32, (H, WC), 1)
        row = lax.broadcasted_iota(jnp.int32, (H, WC), 0)
        keep_wl = lane >= C          # kw = 0 tap: w-1 exists
        keep_wr = lane < WC - C      # kw = 2 tap: w+1 exists
        keep_ht = row >= 1           # kh = 0 tap: h-1 exists
        keep_hb = row < H - 1        # kh = 2 tap: h+1 exists

        def shift_h(v, kh):
            if kh == 1:
                return v
            if H == 1:
                return None          # tap reads only padding -> zero contribution
            if kh == 0:              # out[h] <- in[h-1]
                return jnp.where(keep_ht, pltpu.roll(v, 1, axis=0), 0.0)
            return jnp.where(keep_hb, pltpu.roll(v, H - 1, axis=0), 0.0)

        def shift_w(v, kw):
            if kw == 1:
                return v
            if W == 1:
                return None
            if kw == 0:              # out[w] <- in[w-1]  (shift by C lanes)
                return jnp.where(keep_wl, pltpu.roll(v, C, axis=1), 0.0)
            return jnp.where(keep_wr, pltpu.roll(v, WC - C, axis=1), 0.0)

        @pl.loop(0, TD)
        def _(t):
            # Accumulator seeded with residual + bias (saves two full passes).
            acc = ext_ref[t + 1, :, :] + bias_row
            for kd in range(3):
                s = ext_ref[t + kd, :, :]            # (H, WC) f32
                for kh in range(3):
                    vh = shift_h(s, kh)
                    if vh is None:
                        continue
                    for kw in range(3):
                        vw = shift_w(vh, kw)
                        if vw is None:
                            continue
                        acc = acc + vw * w_rows[kd * 9 + kh * 3 + kw]
            o_ref[t, :, :] = acc.astype(o_ref.dtype)

    grid_spec = pltpu.PrefetchScalarGridSpec(
        num_scalar_prefetch=0,
        grid=(B, n_d),
        in_specs=[
            # main slab of TD depth rows
            pl.BlockSpec((None, TD, H, WC), lambda b, d: (b, d, 0, 0)),
            # 1-row halo just before the slab (clamped; masked in kernel at d==0)
            pl.BlockSpec((None, 1, H, WC),
                         lambda b, d: (b, jnp.maximum(d * TD - 1, 0), 0, 0)),
            # 1-row halo just after the slab (clamped; masked in kernel at last tile)
            pl.BlockSpec((None, 1, H, WC),
                         lambda b, d: (b, jnp.minimum(d * TD + TD, D - 1), 0, 0)),
            pl.BlockSpec((27, WC), lambda b, d: (0, 0)),
            pl.BlockSpec((1, WC), lambda b, d: (0, 0)),
        ],
        out_specs=pl.BlockSpec((None, TD, H, WC), lambda b, d: (b, d, 0, 0)),
        scratch_shapes=[pltpu.VMEM((TD + 2, H, WC), jnp.float32)],
    )

    out = pl.pallas_call(
        kernel,
        out_shape=jax.ShapeDtypeStruct((B, D, H, WC), x.dtype),
        grid_spec=grid_spec,
        compiler_params=pltpu.CompilerParams(
            dimension_semantics=("parallel", "parallel"),
            vmem_limit_bytes=64 * 1024 * 1024,
        ),
    )(x_vol, x_vol, x_vol, w_taps, b_row)

    return out.reshape(B, N, C)


def _reference(x, size, weight, bias):
    """Pure-JAX reference mirroring the PyTorch forward."""
    B, N, C = x.shape
    D, H, W = size
    feat = jnp.transpose(x, (0, 2, 1)).reshape(B, C, D, H, W)
    feat = lax.conv_general_dilated(
        feat, weight,
        window_strides=(1, 1, 1),
        padding="SAME",
        dimension_numbers=("NCDHW", "OIDHW", "NCDHW"),
        feature_group_count=C,
    ) + bias.reshape(1, C, 1, 1, 1)
    feat = jnp.transpose(feat.reshape(B, C, N), (0, 2, 1))
    return x + feat


if __name__ == "__main__":
    key = jax.random.PRNGKey(0)
    k_x, k_w, k_b = jax.random.split(key, 3)

    B, C = 2, 32
    D, H, W = 4, 8, 8
    N = D * H * W

    x = jax.random.normal(k_x, (B, N, C), dtype=jnp.float32)
    # Depthwise Conv3d(dim, dim, k=3, groups=dim): weight (C, 1, 3, 3, 3), bias (C,)
    weight = jax.random.normal(k_w, (C, 1, 3, 3, 3), dtype=jnp.float32) * 0.1
    bias = jax.random.normal(k_b, (C,), dtype=jnp.float32) * 0.1

    out = conv_pos_enc(x, (D, H, W), weight, bias)
    out = jax.block_until_ready(out)

    ref = _reference(x, (D, H, W), weight, bias)
    assert out.shape == (B, N, C)
    assert jnp.allclose(out, ref, atol=1e-4, rtol=1e-4)

    print("KERNEL_OK")
</pallas_src>

<mosaic_0001>
module attributes {stable_mosaic.version = 11 : i64} {
  func.func @kernel(%arg0: i32, %arg1: i32, %arg2: memref<1x4x8x256xf32, #tpu.memory_space<vmem>>, %arg3: memref<1x1x8x256xf32, #tpu.memory_space<vmem>>, %arg4: memref<1x1x8x256xf32, #tpu.memory_space<vmem>>, %arg5: memref<27x256xf32, #tpu.memory_space<vmem>>, %arg6: memref<1x256xf32, #tpu.memory_space<vmem>>, %arg7: memref<1x4x8x256xf32, #tpu.memory_space<vmem>>, %arg8: memref<6x8x256xf32, #tpu.memory_space<vmem>>) attributes {dimension_semantics = [#tpu.dimension_semantics<parallel>, #tpu.dimension_semantics<parallel>], iteration_bounds = array<i64: 2, 1>, scalar_prefetch = 0 : i64, scratch_operands = 1 : i64, tpu.core_type = #tpu.core_type<tc>, window_params = [{transform_indices = @transform_0, window_bounds = array<i64: 1, 4, 8, 256>}, {transform_indices = @transform_1, window_bounds = array<i64: 1, 1, 8, 256>}, {transform_indices = @transform_2, window_bounds = array<i64: 1, 1, 8, 256>}, {pipeline_mode = #tpu.pipeline_mode<synchronous>, transform_indices = @transform_3, window_bounds = array<i64: 27, 256>}, {pipeline_mode = #tpu.pipeline_mode<synchronous>, transform_indices = @transform_4, window_bounds = array<i64: 1, 256>}, {transform_indices = @transform_5, window_bounds = array<i64: 1, 4, 8, 256>}]} {
    %c0_i32 = arith.constant 0 : i32
    %0 = arith.cmpi eq, %arg1, %c0_i32 : i32
    %c0_i32_0 = arith.constant 0 : i32
    %1 = arith.cmpi eq, %arg1, %c0_i32_0 : i32
    %c0 = arith.constant 0 : index
    %c0_1 = arith.constant 0 : index
    %c0_2 = arith.constant 0 : index
    %c0_3 = arith.constant 0 : index
    %2 = vector.load %arg2[%c0, %c0_1, %c0_2, %c0_3] : memref<1x4x8x256xf32, #tpu.memory_space<vmem>>, vector<1x4x8x256xf32>
    %3 = vector.shape_cast %2 : vector<1x4x8x256xf32> to vector<4x8x256xf32>
    %c1 = arith.constant 1 : index
    %c0_4 = arith.constant 0 : index
    %c0_5 = arith.constant 0 : index
    %4 = vector.load %arg8[%c1, %c0_4, %c0_5] : memref<6x8x256xf32, #tpu.memory_space<vmem>>, vector<4x8x256xf32>
    tpu.vector_store %arg8[%c1, %c0_4, %c0_5], %3 {strides = array<i32>} : memref<6x8x256xf32, #tpu.memory_space<vmem>>, vector<4x8x256xf32>,
    %c0_6 = arith.constant 0 : index
    %c0_7 = arith.constant 0 : index
    %c0_8 = arith.constant 0 : index
    %c0_9 = arith.constant 0 : index
    %5 = vector.load %arg3[%c0_6, %c0_7, %c0_8, %c0_9] : memref<1x1x8x256xf32, #tpu.memory_space<vmem>>, vector<1x1x8x256xf32>
    %6 = vector.shape_cast %5 : vector<1x1x8x256xf32> to vector<8x256xf32>
    %c0_10 = arith.constant 0 : index
    %c0_11 = arith.constant 0 : index
    %c0_12 = arith.constant 0 : index
    %c0_13 = arith.constant 0 : index
    %7 = vector.load %arg4[%c0_10, %c0_11, %c0_12, %c0_13] : memref<1x1x8x256xf32, #tpu.memory_space<vmem>>, vector<1x1x8x256xf32>
    %8 = vector.shape_cast %7 : vector<1x1x8x256xf32> to vector<8x256xf32>
    %cst = arith.constant 0.000000e+00 : f32
    %9 = vector.broadcast %cst : f32 to vector<8x256xf32>
    %10 = arith.select %0, %9, %6 : vector<8x256xf32>
    %c0_14 = arith.constant 0 : index
    %c0_15 = arith.constant 0 : index
    %c0_16 = arith.constant 0 : index
    %11 = vector.load %arg8[%c0_14, %c0_15, %c0_16] : memref<6x8x256xf32, #tpu.memory_space<vmem>>, vector<1x8x256xf32>
    %12 = vector.shape_cast %11 : vector<1x8x256xf32> to vector<8x256xf32>
    %13 = vector.shape_cast %10 : vector<8x256xf32> to vector<1x8x256xf32>
    tpu.vector_store %arg8[%c0_14, %c0_15, %c0_16], %13 {strides = array<i32>} : memref<6x8x256xf32, #tpu.memory_space<vmem>>, vector<1x8x256xf32>,
    %cst_17 = arith.constant 0.000000e+00 : f32
    %14 = vector.broadcast %cst_17 : f32 to vector<8x256xf32>
    %15 = arith.select %1, %14, %8 : vector<8x256xf32>
    %c5 = arith.constant 5 : index
    %c0_18 = arith.constant 0 : index
    %c0_19 = arith.constant 0 : index
    %16 = vector.load %arg8[%c5, %c0_18, %c0_19] : memref<6x8x256xf32, #tpu.memory_space<vmem>>, vector<1x8x256xf32>
    %17 = vector.shape_cast %16 : vector<1x8x256xf32> to vector<8x256xf32>
    %18 = vector.shape_cast %15 : vector<8x256xf32> to vector<1x8x256xf32>
    tpu.vector_store %arg8[%c5, %c0_18, %c0_19], %18 {strides = array<i32>} : memref<6x8x256xf32, #tpu.memory_space<vmem>>, vector<1x8x256xf32>,
    %c0_20 = arith.constant 0 : index
    %c0_21 = arith.constant 0 : index
    %19 = vector.load %arg5[%c0_20, %c0_21] : memref<27x256xf32, #tpu.memory_space<vmem>>, vector<1x256xf32>
    %c1_22 = arith.constant 1 : index
    %c0_23 = arith.constant 0 : index
    %20 = vector.load %arg5[%c1_22, %c0_23] : memref<27x256xf32, #tpu.memory_space<vmem>>, vector<1x256xf32>
    %c2 = arith.constant 2 : index
    %c0_24 = arith.constant 0 : index
    %21 = vector.load %arg5[%c2, %c0_24] : memref<27x256xf32, #tpu.memory_space<vmem>>, vector<1x256xf32>
    %c3 = arith.constant 3 : index
    %c0_25 = arith.constant 0 : index
    %22 = vector.load %arg5[%c3, %c0_25] : memref<27x256xf32, #tpu.memory_space<vmem>>, vector<1x256xf32>
    %c4 = arith.constant 4 : index
    %c0_26 = arith.constant 0 : index
    %23 = vector.load %arg5[%c4, %c0_26] : memref<27x256xf32, #tpu.memory_space<vmem>>, vector<1x256xf32>
    %c5_27 = arith.constant 5 : index
    %c0_28 = arith.constant 0 : index
    %24 = vector.load %arg5[%c5_27, %c0_28] : memref<27x256xf32, #tpu.memory_space<vmem>>, vector<1x256xf32>
    %c6 = arith.constant 6 : index
    %c0_29 = arith.constant 0 : index
    %25 = vector.load %arg5[%c6, %c0_29] : memref<27x256xf32, #tpu.memory_space<vmem>>, vector<1x256xf32>
    %c7 = arith.constant 7 : index
    %c0_30 = arith.constant 0 : index
    %26 = vector.load %arg5[%c7, %c0_30] : memref<27x256xf32, #tpu.memory_space<vmem>>, vector<1x256xf32>
    %c8 = arith.constant 8 : index
    %c0_31 = arith.constant 0 : index
    %27 = vector.load %arg5[%c8, %c0_31] : memref<27x256xf32, #tpu.memory_space<vmem>>, vector<1x256xf32>
    %c9 = arith.constant 9 : index
    %c0_32 = arith.constant 0 : index
    %28 = vector.load %arg5[%c9, %c0_32] : memref<27x256xf32, #tpu.memory_space<vmem>>, vector<1x256xf32>
    %c10 = arith.constant 10 : index
    %c0_33 = arith.constant 0 : index
    %29 = vector.load %arg5[%c10, %c0_33] : memref<27x256xf32, #tpu.memory_space<vmem>>, vector<1x256xf32>
    %c11 = arith.constant 11 : index
    %c0_34 = arith.constant 0 : index
    %30 = vector.load %arg5[%c11, %c0_34] : memref<27x256xf32, #tpu.memory_space<vmem>>, vector<1x256xf32>
    %c12 = arith.constant 12 : index
    %c0_35 = arith.constant 0 : index
    %31 = vector.load %arg5[%c12, %c0_35] : memref<27x256xf32, #tpu.memory_space<vmem>>, vector<1x256xf32>
    %c13 = arith.constant 13 : index
    %c0_36 = arith.constant 0 : index
    %32 = vector.load %arg5[%c13, %c0_36] : memref<27x256xf32, #tpu.memory_space<vmem>>, vector<1x256xf32>
    %c14 = arith.constant 14 : index
    %c0_37 = arith.constant 0 : index
    %33 = vector.load %arg5[%c14, %c0_37] : memref<27x256xf32, #tpu.memory_space<vmem>>, vector<1x256xf32>
    %c15 = arith.constant 15 : index
    %c0_38 = arith.constant 0 : index
    %34 = vector.load %arg5[%c15, %c0_38] : memref<27x256xf32, #tpu.memory_space<vmem>>, vector<1x256xf32>
    %c16 = arith.constant 16 : index
    %c0_39 = arith.constant 0 : index
    %35 = vector.load %arg5[%c16, %c0_39] : memref<27x256xf32, #tpu.memory_space<vmem>>, vector<1x256xf32>
    %c17 = arith.constant 17 : index
    %c0_40 = arith.constant 0 : index
    %36 = vector.load %arg5[%c17, %c0_40] : memref<27x256xf32, #tpu.memory_space<vmem>>, vector<1x256xf32>
    %c18 = arith.constant 18 : index
    %c0_41 = arith.constant 0 : index
    %37 = vector.load %arg5[%c18, %c0_41] : memref<27x256xf32, #tpu.memory_space<vmem>>, vector<1x256xf32>
    %c19 = arith.constant 19 : index
    %c0_42 = arith.constant 0 : index
    %38 = vector.load %arg5[%c19, %c0_42] : memref<27x256xf32, #tpu.memory_space<vmem>>, vector<1x256xf32>
    %c20 = arith.constant 20 : index
    %c0_43 = arith.constant 0 : index
    %39 = vector.load %arg5[%c20, %c0_43] : memref<27x256xf32, #tpu.memory_space<vmem>>, vector<1x256xf32>
    %c21 = arith.constant 21 : index
    %c0_44 = arith.constant 0 : index
    %40 = vector.load %arg5[%c21, %c0_44] : memref<27x256xf32, #tpu.memory_space<vmem>>, vector<1x256xf32>
    %c22 = arith.constant 22 : index
    %c0_45 = arith.constant 0 : index
    %41 = vector.load %arg5[%c22, %c0_45] : memref<27x256xf32, #tpu.memory_space<vmem>>, vector<1x256xf32>
    %c23 = arith.constant 23 : index
    %c0_46 = arith.constant 0 : index
    %42 = vector.load %arg5[%c23, %c0_46] : memref<27x256xf32, #tpu.memory_space<vmem>>, vector<1x256xf32>
    %c24 = arith.constant 24 : index
    %c0_47 = arith.constant 0 : index
    %43 = vector.load %arg5[%c24, %c0_47] : memref<27x256xf32, #tpu.memory_space<vmem>>, vector<1x256xf32>
    %c25 = arith.constant 25 : index
    %c0_48 = arith.constant 0 : index
    %44 = vector.load %arg5[%c25, %c0_48] : memref<27x256xf32, #tpu.memory_space<vmem>>, vector<1x256xf32>
    %c26 = arith.constant 26 : index
    %c0_49 = arith.constant 0 : index
    %45 = vector.load %arg5[%c26, %c0_49] : memref<27x256xf32, #tpu.memory_space<vmem>>, vector<1x256xf32>
    %c0_50 = arith.constant 0 : index
    %c0_51 = arith.constant 0 : index
    %46 = vector.load %arg6[%c0_50, %c0_51] : memref<1x256xf32, #tpu.memory_space<vmem>>, vector<1x256xf32>
    %47 = tpu.iota {dimensions = array<i32: 1>} : vector<8x256xi32>
    %48 = tpu.iota {dimensions = array<i32: 0>} : vector<8x256xi32>
    %c32_i32 = arith.constant 32 : i32
    %49 = vector.broadcast %c32_i32 : i32 to vector<8x256xi32>
    %50 = arith.cmpi sge, %47, %49 : vector<8x256xi32>
    %c224_i32 = arith.constant 224 : i32
    %51 = vector.broadcast %c224_i32 : i32 to vector<8x256xi32>
    %52 = arith.cmpi slt, %47, %51 : vector<8x256xi32>
    %c1_i32 = arith.constant 1 : i32
    %53 = vector.broadcast %c1_i32 : i32 to vector<8x256xi32>
    %54 = arith.cmpi sge, %48, %53 : vector<8x256xi32>
    %c7_i32 = arith.constant 7 : i32
    %55 = vector.broadcast %c7_i32 : i32 to vector<8x256xi32>
    %56 = arith.cmpi slt, %48, %55 : vector<8x256xi32>
    %c0_i32_52 = arith.constant 0 : i32
    %c4_i32 = arith.constant 4 : i32
    %57 = arith.addi %c0_i32_52, %c4_i32 : i32
    %c1_i32_53 = arith.constant 1 : i32
    scf.for %arg9 = %c0_i32_52 to %57 step %c1_i32_53  : i32 {
      %c1_i32_55 = arith.constant 1 : i32
      %58 = arith.muli %arg9, %c1_i32_55 : i32
      %c0_i32_56 = arith.constant 0 : i32
      %59 = arith.addi %c0_i32_56, %58 : i32
      %c1_i32_57 = arith.constant 1 : i32
      %60 = arith.addi %59, %c1_i32_57 : i32
      %61 = arith.index_cast %60 : i32 to index
      %c0_58 = arith.constant 0 : index
      %c0_59 = arith.constant 0 : index
      %62 = vector.load %arg8[%61, %c0_58, %c0_59] : memref<6x8x256xf32, #tpu.memory_space<vmem>>, vector<1x8x256xf32>
      %63 = vector.shape_cast %62 : vector<1x8x256xf32> to vector<8x256xf32>
      %64 = vector.broadcast %46 : vector<1x256xf32> to vector<8x256xf32>
      %65 = arith.addf %63, %64 : vector<8x256xf32>
      %c0_i32_60 = arith.constant 0 : i32
      %66 = arith.addi %59, %c0_i32_60 : i32
      %67 = arith.index_cast %66 : i32 to index
      %c0_61 = arith.constant 0 : index
      %c0_62 = arith.constant 0 : index
      %68 = vector.load %arg8[%67, %c0_61, %c0_62] : memref<6x8x256xf32, #tpu.memory_space<vmem>>, vector<1x8x256xf32>
      %69 = vector.shape_cast %68 : vector<1x8x256xf32> to vector<8x256xf32>
      %c1_i32_63 = arith.constant 1 : i32
      %70 = tpu.dynamic_rotate %69 by %c1_i32_63 dim 0 : vector<8x256xf32>, i32 -> vector<8x256xf32>
      %cst_64 = arith.constant 0.000000e+00 : f32
      %71 = vector.broadcast %cst_64 : f32 to vector<8x256xf32>
      %72 = arith.select %54, %70, %71 : vector<8x256xi1>, vector<8x256xf32>
      %c32_i32_65 = arith.constant 32 : i32
      %73 = tpu.dynamic_rotate %72 by %c32_i32_65 dim 1 : vector<8x256xf32>, i32 -> vector<8x256xf32>
      %cst_66 = arith.constant 0.000000e+00 : f32
      %74 = vector.broadcast %cst_66 : f32 to vector<8x256xf32>
      %75 = arith.select %50, %73, %74 : vector<8x256xi1>, vector<8x256xf32>
      %76 = vector.broadcast %19 : vector<1x256xf32> to vector<8x256xf32>
      %77 = arith.mulf %75, %76 : vector<8x256xf32>
      %78 = arith.addf %65, %77 : vector<8x256xf32>
      %79 = vector.broadcast %20 : vector<1x256xf32> to vector<8x256xf32>
      %80 = arith.mulf %72, %79 : vector<8x256xf32>
      %81 = arith.addf %78, %80 : vector<8x256xf32>
      %c224_i32_67 = arith.constant 224 : i32
      %82 = tpu.dynamic_rotate %72 by %c224_i32_67 dim 1 : vector<8x256xf32>, i32 -> vector<8x256xf32>
      %cst_68 = arith.constant 0.000000e+00 : f32
      %83 = vector.broadcast %cst_68 : f32 to vector<8x256xf32>
      %84 = arith.select %52, %82, %83 : vector<8x256xi1>, vector<8x256xf32>
      %85 = vector.broadcast %21 : vector<1x256xf32> to vector<8x256xf32>
      %86 = arith.mulf %84, %85 : vector<8x256xf32>
      %87 = arith.addf %81, %86 : vector<8x256xf32>
      %c32_i32_69 = arith.constant 32 : i32
      %88 = tpu.dynamic_rotate %69 by %c32_i32_69 dim 1 : vector<8x256xf32>, i32 -> vector<8x256xf32>
      %cst_70 = arith.constant 0.000000e+00 : f32
      %89 = vector.broadcast %cst_70 : f32 to vector<8x256xf32>
      %90 = arith.select %50, %88, %89 : vector<8x256xi1>, vector<8x256xf32>
      %91 = vector.broadcast %22 : vector<1x256xf32> to vector<8x256xf32>
      %92 = arith.mulf %90, %91 : vector<8x256xf32>
      %93 = arith.addf %87, %92 : vector<8x256xf32>
      %94 = vector.broadcast %23 : vector<1x256xf32> to vector<8x256xf32>
      %95 = arith.mulf %69, %94 : vector<8x256xf32>
      %96 = arith.addf %93, %95 : vector<8x256xf32>
      %c224_i32_71 = arith.constant 224 : i32
      %97 = tpu.dynamic_rotate %69 by %c224_i32_71 dim 1 : vector<8x256xf32>, i32 -> vector<8x256xf32>
      %cst_72 = arith.constant 0.000000e+00 : f32
      %98 = vector.broadcast %cst_72 : f32 to vector<8x256xf32>
      %99 = arith.select %52, %97, %98 : vector<8x256xi1>, vector<8x256xf32>
      %100 = vector.broadcast %24 : vector<1x256xf32> to vector<8x256xf32>
      %101 = arith.mulf %99, %100 : vector<8x256xf32>
      %102 = arith.addf %96, %101 : vector<8x256xf32>
      %c7_i32_73 = arith.constant 7 : i32
      %103 = tpu.dynamic_rotate %69 by %c7_i32_73 dim 0 : vector<8x256xf32>, i32 -> vector<8x256xf32>
      %cst_74 = arith.constant 0.000000e+00 : f32
      %104 = vector.broadcast %cst_74 : f32 to vector<8x256xf32>
      %105 = arith.select %56, %103, %104 : vector<8x256xi1>, vector<8x256xf32>
      %c32_i32_75 = arith.constant 32 : i32
      %106 = tpu.dynamic_rotate %105 by %c32_i32_75 dim 1 : vector<8x256xf32>, i32 -> vector<8x256xf32>
      %cst_76 = arith.constant 0.000000e+00 : f32
      %107 = vector.broadcast %cst_76 : f32 to vector<8x256xf32>
      %108 = arith.select %50, %106, %107 : vector<8x256xi1>, vector<8x256xf32>
      %109 = vector.broadcast %25 : vector<1x256xf32> to vector<8x256xf32>
      %110 = arith.mulf %108, %109 : vector<8x256xf32>
      %111 = arith.addf %102, %110 : vector<8x256xf32>
      %112 = vector.broadcast %26 : vector<1x256xf32> to vector<8x256xf32>
      %113 = arith.mulf %105, %112 : vector<8x256xf32>
      %114 = arith.addf %111, %113 : vector<8x256xf32>
      %c224_i32_77 = arith.constant 224 : i32
      %115 = tpu.dynamic_rotate %105 by %c224_i32_77 dim 1 : vector<8x256xf32>, i32 -> vector<8x256xf32>
      %cst_78 = arith.constant 0.000000e+00 : f32
      %116 = vector.broadcast %cst_78 : f32 to vector<8x256xf32>
      %117 = arith.select %52, %115, %116 : vector<8x256xi1>, vector<8x256xf32>
      %118 = vector.broadcast %27 : vector<1x256xf32> to vector<8x256xf32>
      %119 = arith.mulf %117, %118 : vector<8x256xf32>
      %120 = arith.addf %114, %119 : vector<8x256xf32>
      %c1_i32_79 = arith.constant 1 : i32
      %121 = arith.addi %59, %c1_i32_79 : i32
      %122 = arith.index_cast %121 : i32 to index
      %c0_80 = arith.constant 0 : index
      %c0_81 = arith.constant 0 : index
      %123 = vector.load %arg8[%122, %c0_80, %c0_81] : memref<6x8x256xf32, #tpu.memory_space<vmem>>, vector<1x8x256xf32>
      %124 = vector.shape_cast %123 : vector<1x8x256xf32> to vector<8x256xf32>
      %c1_i32_82 = arith.constant 1 : i32
      %125 = tpu.dynamic_rotate %124 by %c1_i32_82 dim 0 : vector<8x256xf32>, i32 -> vector<8x256xf32>
      %cst_83 = arith.constant 0.000000e+00 : f32
      %126 = vector.broadcast %cst_83 : f32 to vector<8x256xf32>
      %127 = arith.select %54, %125, %126 : vector<8x256xi1>, vector<8x256xf32>
      %c32_i32_84 = arith.constant 32 : i32
      %128 = tpu.dynamic_rotate %127 by %c32_i32_84 dim 1 : vector<8x256xf32>, i32 -> vector<8x256xf32>
      %cst_85 = arith.constant 0.000000e+00 : f32
      %129 = vector.broadcast %cst_85 : f32 to vector<8x256xf32>
      %130 = arith.select %50, %128, %129 : vector<8x256xi1>, vector<8x256xf32>
      %131 = vector.broadcast %28 : vector<1x256xf32> to vector<8x256xf32>
      %132 = arith.mulf %130, %131 : vector<8x256xf32>
      %133 = arith.addf %120, %132 : vector<8x256xf32>
      %134 = vector.broadcast %29 : vector<1x256xf32> to vector<8x256xf32>
      %135 = arith.mulf %127, %134 : vector<8x256xf32>
      %136 = arith.addf %133, %135 : vector<8x256xf32>
      %c224_i32_86 = arith.constant 224 : i32
      %137 = tpu.dynamic_rotate %127 by %c224_i32_86 dim 1 : vector<8x256xf32>, i32 -> vector<8x256xf32>
      %cst_87 = arith.constant 0.000000e+00 : f32
      %138 = vector.broadcast %cst_87 : f32 to vector<8x256xf32>
      %139 = arith.select %52, %137, %138 : vector<8x256xi1>, vector<8x256xf32>
      %140 = vector.broadcast %30 : vector<1x256xf32> to vector<8x256xf32>
      %141 = arith.mulf %139, %140 : vector<8x256xf32>
      %142 = arith.addf %136, %141 : vector<8x256xf32>
      %c32_i32_88 = arith.constant 32 : i32
      %143 = tpu.dynamic_rotate %124 by %c32_i32_88 dim 1 : vector<8x256xf32>, i32 -> vector<8x256xf32>
      %cst_89 = arith.constant 0.000000e+00 : f32
      %144 = vector.broadcast %cst_89 : f32 to vector<8x256xf32>
      %145 = arith.select %50, %143, %144 : vector<8x256xi1>, vector<8x256xf32>
      %146 = vector.broadcast %31 : vector<1x256xf32> to vector<8x256xf32>
      %147 = arith.mulf %145, %146 : vector<8x256xf32>
      %148 = arith.addf %142, %147 : vector<8x256xf32>
      %149 = vector.broadcast %32 : vector<1x256xf32> to vector<8x256xf32>
      %150 = arith.mulf %124, %149 : vector<8x256xf32>
      %151 = arith.addf %148, %150 : vector<8x256xf32>
      %c224_i32_90 = arith.constant 224 : i32
      %152 = tpu.dynamic_rotate %124 by %c224_i32_90 dim 1 : vector<8x256xf32>, i32 -> vector<8x256xf32>
      %cst_91 = arith.constant 0.000000e+00 : f32
      %153 = vector.broadcast %cst_91 : f32 to vector<8x256xf32>
      %154 = arith.select %52, %152, %153 : vector<8x256xi1>, vector<8x256xf32>
      %155 = vector.broadcast %33 : vector<1x256xf32> to vector<8x256xf32>
      %156 = arith.mulf %154, %155 : vector<8x256xf32>
      %157 = arith.addf %151, %156 : vector<8x256xf32>
      %c7_i32_92 = arith.constant 7 : i32
      %158 = tpu.dynamic_rotate %124 by %c7_i32_92 dim 0 : vector<8x256xf32>, i32 -> vector<8x256xf32>
      %cst_93 = arith.constant 0.000000e+00 : f32
      %159 = vector.broadcast %cst_93 : f32 to vector<8x256xf32>
      %160 = arith.select %56, %158, %159 : vector<8x256xi1>, vector<8x256xf32>
      %c32_i32_94 = arith.constant 32 : i32
      %161 = tpu.dynamic_rotate %160 by %c32_i32_94 dim 1 : vector<8x256xf32>, i32 -> vector<8x256xf32>
      %cst_95 = arith.constant 0.000000e+00 : f32
      %162 = vector.broadcast %cst_95 : f32 to vector<8x256xf32>
      %163 = arith.select %50, %161, %162 : vector<8x256xi1>, vector<8x256xf32>
      %164 = vector.broadcast %34 : vector<1x256xf32> to vector<8x256xf32>
      %165 = arith.mulf %163, %164 : vector<8x256xf32>
      %166 = arith.addf %157, %165 : vector<8x256xf32>
      %167 = vector.broadcast %35 : vector<1x256xf32> to vector<8x256xf32>
      %168 = arith.mulf %160, %167 : vector<8x256xf32>
      %169 = arith.addf %166, %168 : vector<8x256xf32>
      %c224_i32_96 = arith.constant 224 : i32
      %170 = tpu.dynamic_rotate %160 by %c224_i32_96 dim 1 : vector<8x256xf32>, i32 -> vector<8x256xf32>
      %cst_97 = arith.constant 0.000000e+00 : f32
      %171 = vector.broadcast %cst_97 : f32 to vector<8x256xf32>
      %172 = arith.select %52, %170, %171 : vector<8x256xi1>, vector<8x256xf32>
      %173 = vector.broadcast %36 : vector<1x256xf32> to vector<8x256xf32>
      %174 = arith.mulf %172, %173 : vector<8x256xf32>
      %175 = arith.addf %169, %174 : vector<8x256xf32>
      %c2_i32 = arith.constant 2 : i32
      %176 = arith.addi %59, %c2_i32 : i32
      %177 = arith.index_cast %176 : i32 to index
      %c0_98 = arith.constant 0 : index
      %c0_99 = arith.constant 0 : index
      %178 = vector.load %arg8[%177, %c0_98, %c0_99] : memref<6x8x256xf32, #tpu.memory_space<vmem>>, vector<1x8x256xf32>
      %179 = vector.shape_cast %178 : vector<1x8x256xf32> to vector<8x256xf32>
      %c1_i32_100 = arith.constant 1 : i32
      %180 = tpu.dynamic_rotate %179 by %c1_i32_100 dim 0 : vector<8x256xf32>, i32 -> vector<8x256xf32>
      %cst_101 = arith.constant 0.000000e+00 : f32
      %181 = vector.broadcast %cst_101 : f32 to vector<8x256xf32>
      %182 = arith.select %54, %180, %181 : vector<8x256xi1>, vector<8x256xf32>
      %c32_i32_102 = arith.constant 32 : i32
      %183 = tpu.dynamic_rotate %182 by %c32_i32_102 dim 1 : vector<8x256xf32>, i32 -> vector<8x256xf32>
      %cst_103 = arith.constant 0.000000e+00 : f32
      %184 = vector.broadcast %cst_103 : f32 to vector<8x256xf32>
      %185 = arith.select %50, %183, %184 : vector<8x256xi1>, vector<8x256xf32>
      %186 = vector.broadcast %37 : vector<1x256xf32> to vector<8x256xf32>
      %187 = arith.mulf %185, %186 : vector<8x256xf32>
      %188 = arith.addf %175, %187 : vector<8x256xf32>
      %189 = vector.broadcast %38 : vector<1x256xf32> to vector<8x256xf32>
      %190 = arith.mulf %182, %189 : vector<8x256xf32>
      %191 = arith.addf %188, %190 : vector<8x256xf32>
      %c224_i32_104 = arith.constant 224 : i32
      %192 = tpu.dynamic_rotate %182 by %c224_i32_104 dim 1 : vector<8x256xf32>, i32 -> vector<8x256xf32>
      %cst_105 = arith.constant 0.000000e+00 : f32
      %193 = vector.broadcast %cst_105 : f32 to vector<8x256xf32>
      %194 = arith.select %52, %192, %193 : vector<8x256xi1>, vector<8x256xf32>
      %195 = vector.broadcast %39 : vector<1x256xf32> to vector<8x256xf32>
      %196 = arith.mulf %194, %195 : vector<8x256xf32>
      %197 = arith.addf %191, %196 : vector<8x256xf32>
      %c32_i32_106 = arith.constant 32 : i32
      %198 = tpu.dynamic_rotate %179 by %c32_i32_106 dim 1 : vector<8x256xf32>, i32 -> vector<8x256xf32>
      %cst_107 = arith.constant 0.000000e+00 : f32
      %199 = vector.broadcast %cst_107 : f32 to vector<8x256xf32>
      %200 = arith.select %50, %198, %199 : vector<8x256xi1>, vector<8x256xf32>
      %201 = vector.broadcast %40 : vector<1x256xf32> to vector<8x256xf32>
      %202 = arith.mulf %200, %201 : vector<8x256xf32>
      %203 = arith.addf %197, %202 : vector<8x256xf32>
      %204 = vector.broadcast %41 : vector<1x256xf32> to vector<8x256xf32>
      %205 = arith.mulf %179, %204 : vector<8x256xf32>
      %206 = arith.addf %203, %205 : vector<8x256xf32>
      %c224_i32_108 = arith.constant 224 : i32
      %207 = tpu.dynamic_rotate %179 by %c224_i32_108 dim 1 : vector<8x256xf32>, i32 -> vector<8x256xf32>
      %cst_109 = arith.constant 0.000000e+00 : f32
      %208 = vector.broadcast %cst_109 : f32 to vector<8x256xf32>
      %209 = arith.select %52, %207, %208 : vector<8x256xi1>, vector<8x256xf32>
      %210 = vector.broadcast %42 : vector<1x256xf32> to vector<8x256xf32>
      %211 = arith.mulf %209, %210 : vector<8x256xf32>
      %212 = arith.addf %206, %211 : vector<8x256xf32>
      %c7_i32_110 = arith.constant 7 : i32
      %213 = tpu.dynamic_rotate %179 by %c7_i32_110 dim 0 : vector<8x256xf32>, i32 -> vector<8x256xf32>
      %cst_111 = arith.constant 0.000000e+00 : f32
      %214 = vector.broadcast %cst_111 : f32 to vector<8x256xf32>
      %215 = arith.select %56, %213, %214 : vector<8x256xi1>, vector<8x256xf32>
      %c32_i32_112 = arith.constant 32 : i32
      %216 = tpu.dynamic_rotate %215 by %c32_i32_112 dim 1 : vector<8x256xf32>, i32 -> vector<8x256xf32>
      %cst_113 = arith.constant 0.000000e+00 : f32
      %217 = vector.broadcast %cst_113 : f32 to vector<8x256xf32>
      %218 = arith.select %50, %216, %217 : vector<8x256xi1>, vector<8x256xf32>
      %219 = vector.broadcast %43 : vector<1x256xf32> to vector<8x256xf32>
      %220 = arith.mulf %218, %219 : vector<8x256xf32>
      %221 = arith.addf %212, %220 : vector<8x256xf32>
      %222 = vector.broadcast %44 : vector<1x256xf32> to vector<8x256xf32>
      %223 = arith.mulf %215, %222 : vector<8x256xf32>
      %224 = arith.addf %221, %223 : vector<8x256xf32>
      %c224_i32_114 = arith.constant 224 : i32
      %225 = tpu.dynamic_rotate %215 by %c224_i32_114 dim 1 : vector<8x256xf32>, i32 -> vector<8x256xf32>
      %cst_115 = arith.constant 0.000000e+00 : f32
      %226 = vector.broadcast %cst_115 : f32 to vector<8x256xf32>
      %227 = arith.select %52, %225, %226 : vector<8x256xi1>, vector<8x256xf32>
      %228 = vector.broadcast %45 : vector<1x256xf32> to vector<8x256xf32>
      %229 = arith.mulf %227, %228 : vector<8x256xf32>
      %230 = arith.addf %224, %229 : vector<8x256xf32>
      %c0_116 = arith.constant 0 : index
      %231 = arith.index_cast %59 : i32 to index
      %c0_117 = arith.constant 0 : index
      %c0_118 = arith.constant 0 : index
      %232 = vector.load %arg7[%c0_116, %231, %c0_117, %c0_118] : memref<1x4x8x256xf32, #tpu.memory_space<vmem>>, vector<1x1x8x256xf32>
      %233 = vector.shape_cast %232 : vector<1x1x8x256xf32> to vector<8x256xf32>
      %234 = vector.shape_cast %230 : vector<8x256xf32> to vector<1x1x8x256xf32>
      tpu.vector_store %arg7[%c0_116, %231, %c0_117, %c0_118], %234 {strides = array<i32>} : memref<1x4x8x256xf32, #tpu.memory_space<vmem>>, vector<1x1x8x256xf32>,
    }
    %c4_i32_54 = arith.constant 4 : i32
    return
  }
  func.func @transform_0(%arg0: i32, %arg1: i32) -> (i32, i32, i32, i32) {
    %c0_i32 = arith.constant 0 : i32
    %c0_i32_0 = arith.constant 0 : i32
    %c0_i32_1 = arith.constant 0 : i32
    return %arg0, %arg1, %c0_i32, %c0_i32_0 : i32, i32, i32, i32
  }
  func.func @transform_1(%arg0: i32, %arg1: i32) -> (i32, i32, i32, i32) {
    %c4_i32 = arith.constant 4 : i32
    %0 = arith.muli %arg1, %c4_i32 : i32
    %c1_i32 = arith.constant 1 : i32
    %1 = arith.subi %0, %c1_i32 : i32
    %c0_i32 = arith.constant 0 : i32
    %2 = arith.maxsi %1, %c0_i32 : i32
    %c0_i32_0 = arith.constant 0 : i32
    %c0_i32_1 = arith.constant 0 : i32
    %c0_i32_2 = arith.constant 0 : i32
    return %arg0, %2, %c0_i32_0, %c0_i32_1 : i32, i32, i32, i32
  }
  func.func @transform_2(%arg0: i32, %arg1: i32) -> (i32, i32, i32, i32) {
    %c4_i32 = arith.constant 4 : i32
    %0 = arith.muli %arg1, %c4_i32 : i32
    %c4_i32_0 = arith.constant 4 : i32
    %1 = arith.addi %0, %c4_i32_0 : i32
    %c3_i32 = arith.constant 3 : i32
    %2 = arith.minsi %1, %c3_i32 : i32
    %c0_i32 = arith.constant 0 : i32
    %c0_i32_1 = arith.constant 0 : i32
    %c0_i32_2 = arith.constant 0 : i32
    return %arg0, %2, %c0_i32, %c0_i32_1 : i32, i32, i32, i32
  }
  func.func @transform_3(%arg0: i32, %arg1: i32) -> (i32, i32) {
    %c0_i32 = arith.constant 0 : i32
    %c0_i32_0 = arith.constant 0 : i32
    %c0_i32_1 = arith.constant 0 : i32
    return %c0_i32, %c0_i32_0 : i32, i32
  }
  func.func @transform_4(%arg0: i32, %arg1: i32) -> (i32, i32) {
    %c0_i32 = arith.constant 0 : i32
    %c0_i32_0 = arith.constant 0 : i32
    %c0_i32_1 = arith.constant 0 : i32
    return %c0_i32, %c0_i32_0 : i32, i32
  }
  func.func @transform_5(%arg0: i32, %arg1: i32) -> (i32, i32, i32, i32) {
    %c0_i32 = arith.constant 0 : i32
    %c0_i32_0 = arith.constant 0 : i32
    %c0_i32_1 = arith.constant 0 : i32
    return %arg0, %arg1, %c0_i32, %c0_i32_0 : i32, i32, i32, i32
  }
}

</mosaic_0001>

<bundles_post_ra>
// kernel: tpu_custom_call.1
= control target key start
LH: loop header
LB: loop body
LE: loop exit
PB: predicated region body
PF: predicated region fallthrough
CT: control target
= control target key end

     0   :  { %s2406_s0 = inlined_call_operand.hbm [shape: f32[2,4,8,256], index: 0, kind: input, shape index: {}]   ;;  %s2407_s1 = inlined_call_operand.hbm [shape: f32[2,4,8,256], index: 1, kind: input, shape index: {}]   ;;  %s2408_s2 = inlined_call_operand.hbm [shape: f32[2,4,8,256], index: 2, kind: input, shape index: {}]   ;;  %s2409_s3 = inlined_call_operand.hbm [shape: f32[27,256], index: 3, kind: input, shape index: {}]   ;;  %s2410_s4 = inlined_call_operand.vmem [shape: f32[1,256], index: 4, kind: input, shape index: {}]   ;;  %s2411_s5 = inlined_call_operand.hbm [shape: f32[2,4,8,256], index: 5, kind: output, shape index: {}]  }
   0x1   :  { %2437 = sst [smem:[#allocation37_spill]] %s2406_s0 }
   0x2   :  { %2438 = sst [smem:[#allocation38_spill]] %s2407_s1 }
   0x3   :  { %2439 = sst [smem:[#allocation39_spill]] %s2409_s3 }
   0x4   :  { %10 = vsyncpa [#allocation4], 0 }
   0x5   :  { %12 = vsyncpa [#allocation4 + $0x1], 0 }
   0x6   :  { %13 = vsyncpa [#allocation7], 0 }
   0x7   :  { %15 = vsyncpa [#allocation7 + $0x1], 0 }
   0x8   :  { %16 = vsyncpa [#allocation10], 0 }
   0x9   :  { %17 = vsyncpa [#allocation5], 0 }
   0xa   :  { %19 = vsyncpa [#allocation5 + $0x1], 0  ;;  %s1674_s18 = smov 0   ;;  %s1676_s19 = smov 0  }
   0xb   :  { %s1678_s20 = smov 0   ;;  %s1680_s21 = smov 0  }
   0xc   :  { %s1682_s22 = smov 0   ;;  %s1684_s23 = smov 0  }
   0xd LB: > { %2440 = sst [smem:[#allocation16_spill]] %s1614_s20  ;;  %s37_s24 = sadd.s32 1, %s1622_s22  ;;  %s1626_s23 = sphi %s1684_s23, %s25_s23   ;;  %s1622_s22 = sphi %s1682_s22, %s2498_s22   ;;  %s1618_s21 = sphi %s1680_s21, %s2497_s21   ;;  %s1614_s20 = sphi %s1678_s20, %s2496_s20   ;;  %s1610_s19 = sphi %s1676_s19, %s2500_s19   ;;  %s1606_s18 = sphi %s1674_s18, %s2499_s18  }
   0xe   : > { %2441 = sst [smem:[#allocation17_spill]] %s1622_s22  ;;  %s46_s25 = sadd.s32 1, %s1614_s20 }
   0xf   : > { %2442 = sst [smem:[#allocation18_spill]] %s1626_s23  ;;  %p39_p0 = scmp.ge.s32.totalorder %s37_s24, 2 }
  0x10   : > { %p53_p1 = scmp.ne.s32.totalorder %s1614_s20, %s1610_s19  ;;  %p54_p2 = scmp.eq.s32.totalorder %s1626_s23, 0 }
  0x11   : > { %s2502_s24 = smov (%p39_p0, %s37_s24), 0  ;;  %p1357_p5 = scmp.lt.s32.totalorder %s1626_s23, 2 }
  0x12   : > { %2443 = sst [smem:[#allocation19_spill]] %s2502_s24  ;;  %p55_p4 = por %p54_p2, %p53_p1 }
  0x13   : > { %s41_s26 = ssub.s32 %s1622_s22, %s2502_s24  ;;  %s1719_s27 = sand.u32 1, %s1614_s20  }
  0x14   : > { %p44_p6 = scmp.eq.s32.totalorder %s41_s26, 0  ;;  %s1722_s28 = sshll.u32 %s1622_s22, 10 }
  0x15   : > { %s2444_s0 = sld [smem:[#allocation37_spill]]  ;;  %p1728_p7 = pnand %p1357_p5, %p55_p4 }
  0x16   : > { %s1733_s8 = scalar_select %p44_p6, %s1614_s20, %s46_s25  }
  0x17   : > { %s265_s9 = sand.u32 1, %s1626_s23   ;;  %s2412_s10 = sshll.u32 %s1719_s27, 4 }
  0x18   : > { %2446 = sst [smem:[#allocation20_spill]] %s1733_s8  ;;  %s269_s14 = scalar_lea.vmem [#allocation6], %s2412_s10 }
  0x19   : > { %s2447_s1 = sld [smem:[#allocation38_spill]]  ;;  %s283_s15 = sshll.u32 %s269_s14, 4  ;;  %s284_s15 = int_to_ptr.vmem [resolvable:$true] %s283_s15 }
  0x1a   : > { %s1743_s16 = scalar_lea.sflag [#allocation7], %s265_s9  ;;  %p2413_p8 = pneg %p1728_p7 }
  0x1b   : > { %s1437_s17 = scalar_lea.vmem %s284_s15, 256  ;;  %s1632_s25 = smov [#allocation6]  }
  0x1c   : > { %p1438_p9 = scmp.ne.s32.totalorder %s284_s15, %s1437_s17  ;;  %s1442_s26 = sshll.u32 %s1632_s25, 4  ;;  %s1443_s26 = int_to_ptr.vmem [resolvable:$false] %s1442_s26 }
  0x1d   : > { %s1444_s29 = scalar_lea.vmem %s1443_s26, 512  ;;  %p1445_p12 = scmp.lt.s32.totalorder %s284_s15, %s1443_s26 }
  0x1e   : > { %p1440_p10 = pnand %p1438_p9, %p2413_p8  ;;  %p1446_p13 = scmp.lt.s32.totalorder %s1444_s29, %s1437_s17 }
  0x1f   : > { %s281_s13 = scalar_lea.hbm %s2447_s1, %s1722_s28 }
  0x20   : > { %p1441_p11 = pneg %p1440_p10  ;;  %p1447_p0 = por %p1446_p13, %p1445_p12 }
  0x22   : > { %p1448_p2 = pnand %p1447_p0, %p1441_p11 }
  0x24   : > { %1451 = shalt.err (!%p1448_p2)
}
  0x25   : > { %1348 = dma.hbm_to_vmem [thread:$0]  (!%p1728_p7), %s281_s13, 256, %s284_s15, %s1743_s16  }
  0x26   : > { %s1754_s30 = sadd.s32 4294967295, %s1626_s23   ;;  %s1285_s9 = sadd.s32 4294967294, %s1626_s23  }
  0x27   : > { %p59_p4 = scmp.ne.s32.totalorder %s1610_s19, %s1606_s18  ;;  %p60_p5 = scmp.eq.s32.totalorder %s1754_s30, 0 }
  0x28   : > { %p199_p6 = scmp.eq.s32.totalorder %s1754_s30, 1  ;;  %p205_p9 = scmp.eq.s32.totalorder %s1285_s9, 1 }
  0x29   : > { %p1286_p10 = scmp.ge.s32.totalorder %s1626_s23, 1  ;;  %p1764_p11 = por %p60_p5, %p59_p4 }
  0x2a   : > { %p1771_p12 = por %p199_p6, %p53_p1  ;;  %p1775_p13 = por %p205_p9, %p59_p4 }
  0x2b   : > { %p212_p0 = scmp.lt.s32.totalorder %s1626_s23, 3  ;;  %s1633_s15 = smov [#allocation9]  }
  0x2c   : > { %s2449_s12 = scalar_select %p1771_p12, 1, 0 }
  0x2d   : > { %s2450_s13 = scalar_select %p1775_p13, 1, 0 }
  0x2e   : > { %p1780_p2 = pnand %p1286_p10, %p212_p0  ;;  %s224_s17 = sshll.u32 %s1633_s15, 4  ;;  %s225_s17 = int_to_ptr.vmem [resolvable:$true] %s224_s17 }
  0x2f   : > { %s1289_s25 = sshll.u32 %s1719_s27, 6  ;;  %s1463_s6 = scalar_lea.vmem %s225_s17, 1024 }
  0x30   : > { %p1338_p3 = pneg %p1780_p2  ;;  %s245_s29 = scalar_lea.vmem [#allocation3], %s1289_s25 }
  0x31   : > { %s255_s9 = sshll.u32 %s245_s29, 4  ;;  %p1464_p6 = scmp.ne.s32.totalorder %s225_s17, %s1463_s6  ;;  %s1794_s9 = int_to_ptr.vmem [resolvable:$true] %s255_s9 }
  0x32   : > { %p1789_p1 = pnand %p1338_p3, %p60_p5  ;;  %p1471_p0 = scmp.lt.s32.totalorder %s225_s17, %s225_s17 }
  0x33   : > { %p1472_p8 = scmp.lt.s32.totalorder %s1463_s6, %s1463_s6 }
  0x34   : > { %p1454_p4 = pneg %p1789_p1 }
  0x35   : > { %p1473_p13 = por %p1472_p8, %p1471_p0 }
  0x36   : > { %p1466_p9 = pnand %p1464_p6, %p1454_p4 }
  0x38   : > { %p1467_p10 = pneg %p1466_p9 }
  0x3a   : > { %p1474_p12 = pnand %p1473_p13, %p1467_p10 }
  0x3c   : > { %1477 = shalt.err (!%p1474_p12)
}
  0x3d   : > { %s1634_s15 = smov 256   ;;  %s1635_s25 = smov 16  }
  0x3e   : > { %s2453_s3 = sld [smem:[#allocation39_spill]]  ;;  %s242_s1 = scalar_lea.sflag [#allocation4], %s1719_s27 }
  0x3f   : > { %s1491_s24 = scalar_lea.vmem %s1794_s9, 1024  ;;  %p2454_p8 = pneg %p1728_p7 }
  0x40   : > { %p1492_p3 = scmp.ne.s32.totalorder %s1794_s9, %s1491_s24  ;;  %s1636_s6 = smov [#allocation3]  }
  0x41   : > { %s1496_s22 = sshll.u32 %s1636_s6, 4  ;;  %s1497_s22 = int_to_ptr.vmem [resolvable:$false] %s1496_s22 }
  0x42   : > { %p1494_p13 = pnand %p1492_p3, %p2454_p8  ;;  %s1498_s8 = scalar_lea.vmem %s1497_s22, 2048 }
  0x43   : > { %p1499_p4 = scmp.lt.s32.totalorder %s1794_s9, %s1497_s22  ;;  %p1500_p6 = scmp.lt.s32.totalorder %s1498_s8, %s1491_s24 }
  0x44   : > { %1341 = dma.hbm_to_vmem [thread:$0]  (!%p1789_p1), %s2453_s3, 1024, %s225_s17, [#allocation10], %s1634_s15, %s1634_s15, %s1635_s25  }
  0x45   : > { %p1495_p12 = pneg %p1494_p13  ;;  %p1501_p9 = por %p1500_p6, %p1499_p4 }
  0x47   : > { %p1502_p10 = pnand %p1501_p9, %p1495_p12 }
  0x49   : > { %1505 = shalt.err (!%p1502_p10)
}
  0x4a   : > { %s2455_s26 = scalar_lea.hbm %s2444_s0, %s1722_s28  ;;  %s2456_s29 = sadd.s32 768, %s1722_s28 }
  0x4b   : > { %1345 = dma.hbm_to_vmem [thread:$0]  (!%p1728_p7), %s2455_s26, 1024, %s1794_s9, %s242_s1, %s1634_s15, %s1634_s15, %s1635_s25  }
  0x4c   : > { %s306_s22 = scalar_lea.hbm %s2408_s2, %s2456_s29  ;;  %s2457_s24 = sshll.u32 %s1719_s27, 4 }
  0x4d   : > { %s294_s8 = scalar_lea.vmem [#allocation8], %s2457_s24  ;;  %p2458_p0 = pmov %p2454_p8 }
  0x4e   : > { %s308_s20 = sshll.u32 %s294_s8, 4  ;;  %s1637_s10 = smov [#allocation8]   ;;  %s309_s20 = int_to_ptr.vmem [resolvable:$true] %s308_s20 }
  0x4f   : > { %s1519_s23 = scalar_lea.vmem %s309_s20, 256  ;;  %s1524_s17 = sshll.u32 %s1637_s10, 4  ;;  %s1525_s17 = int_to_ptr.vmem [resolvable:$false] %s1524_s17 }
  0x50   : > { %p1520_p1 = scmp.ne.s32.totalorder %s309_s20, %s1519_s23  ;;  %s1526_s0 = scalar_lea.vmem %s1525_s17, 512 }
  0x51   : > { %p1527_p13 = scmp.lt.s32.totalorder %s309_s20, %s1525_s17  ;;  %p1528_p12 = scmp.lt.s32.totalorder %s1526_s0, %s1519_s23 }
  0x52   : > { %p1522_p3 = pnand %p1520_p1, %p2458_p0 }
  0x53   : > { %p1529_p4 = por %p1528_p12, %p1527_p13 }
  0x54   : > { %p1523_p8 = pneg %p1522_p3 }
  0x56   : > { %p1530_p6 = pnand %p1529_p4, %p1523_p8 }
  0x58   : > { %1533 = shalt.err (!%p1530_p6)
}
  0x59   : > { %1351 = dma.hbm_to_vmem [thread:$0]  (!%p1728_p7), %s306_s22, 256, %s309_s20, %s1743_s16  }
  0x5a   : > { %317 = sbr.rel (%p1780_p2) target bundleno = 337 (0x151), region = 40 }
  0x5f   : > { %s1834_s1 = sand.u32 1, %s1610_s19  }
  0x60   : > { %s1299_s3 = sshll.u32 %s1834_s1, 6  ;;  %s320_s27 = scalar_lea.sflag [#allocation4], %s1834_s1 }
  0x61   : > { %s1840_s0 = scalar_lea.vmem [#allocation3], %s1299_s3 }
  0x62   : > { %1589 = dma.done.wait (%p1764_p11), %s320_s27, 1024  }
  0x63   : > { %1591 = vsyncadd (%p1764_p11), %s320_s27, 4294966272  ;;  %s328_s20 = sand.u32 1, %s1754_s30  }
  0x64   : > { %s329_s23 = scalar_lea.sflag [#allocation7], %s328_s20 }
  0x65   : > { %1593 = dma.done.wait (%p1764_p11), %s329_s23, 512  }
  0x66   : > { %1595 = vsyncadd (%p1764_p11), %s329_s23, 4294966784 }
  0x67   : > { %1597 = dma.done.wait (%p60_p5), [#allocation10], 1024  }
  0x68   : > { %1599 = vsyncadd (%p60_p5), [#allocation10], 4294966272  ;;  %v480_v0 = vlaneseq  ;;  %v1638_v1 = vmov 0.0   ;;  %v1866_v5 = vld [vmem:[#allocation9] ss:$8 sm:$0x3] }
  0x69   : > { %419 = vst [vmem:[#allocation2] sm:$0xff] %v1638_v1  ;;  %420 = vst [vmem:[#allocation2 + $0x8] sm:$0xff] %v1638_v1  ;;  %v1868_v6 = vld [vmem:[#allocation9 + $0x1] ss:$8 sm:$0x3]  ;;  %v395_v35 = vld [vmem:[%s1840_s0 + $0x10] sm:$0xff] }
  0x6a   : > { %424 = vst [vmem:[#allocation2 + $0x50] sm:$0xff] %v1638_v1  ;;  %425 = vst [vmem:[#allocation2 + $0x58] sm:$0xff] %v1638_v1  ;;  %v1855_v2 = vand.u32 127, %v480_v0  ;;  %v1857_v3 = vshrl.u32 %v480_v0, 7  ;;  %v1923_v32 = vld [vmem:[%s2410_s4] sm:$0x3] }
  0x6b   : > { %2460 = vst [vmem:[#allocation22_spill] sm:$0xff] %v1866_v5  ;;  %2461 = vst [vmem:[#allocation23_spill] sm:$0xff] %v1868_v6  ;;  %v1870_v7 = vld [vmem:[#allocation9 + $0x2] ss:$8 sm:$0x3]  ;;  %v396_v36 = vld [vmem:[%s1840_s0 + $0x18] sm:$0xff] }
  0x6c   : > { %2459 = vst [vmem:[#allocation21_spill] sm:$0xff] %v1857_v3  ;;  %v1860_v4 = vadd.s32 128, %v1855_v2  ;;  %vm485_vm0 = vcmp.ge.s32.totalorder %v1855_v2, 32  ;;  %vm489_vm1 = vcmp.ge.s32.totalorder %v1857_v3, 1  ;;  %vm490_vm2 = vcmp.lt.s32.totalorder %v1857_v3, 7  ;;  %2462 = vst [vmem:[#allocation24_spill] sm:$0xff] %v1870_v7 }
  0x6d   : > { %v1872_v8 = vld [vmem:[#allocation9 + $0x3] ss:$8 sm:$0x3]  ;;  %v1874_v9 = vld [vmem:[#allocation9 + $0x4] ss:$8 sm:$0x3] }
  0x6e   : > { %vm488_vm3 = vcmp.lt.s32.totalorder %v1860_v4, 224  ;;  %2463 = vst [vmem:[#allocation25_spill] sm:$0xff] %v1872_v8  ;;  %2464 = vst [vmem:[#allocation26_spill] sm:$0xff] %v1874_v9  ;;  %v1876_v10 = vld [vmem:[#allocation9 + $0x5] ss:$8 sm:$0x3] }
  0x6f   : > { %v1878_v11 = vld [vmem:[#allocation9 + $0x6] ss:$8 sm:$0x3]  ;;  %v1880_v12 = vld [vmem:[#allocation9 + $0x7] ss:$8 sm:$0x3] }
  0x70   : > { %v1882_v13 = vld [vmem:[#allocation9 + $0x10] ss:$8 sm:$0x3]  ;;  %v1884_v14 = vld [vmem:[#allocation9 + $0x11] ss:$8 sm:$0x3] }
  0x71   : > { %v1886_v15 = vld [vmem:[#allocation9 + $0x12] ss:$8 sm:$0x3]  ;;  %v1888_v16 = vld [vmem:[#allocation9 + $0x13] ss:$8 sm:$0x3] }
  0x72   : > { %v1890_v17 = vld [vmem:[#allocation9 + $0x14] ss:$8 sm:$0x3]  ;;  %v1892_v18 = vld [vmem:[#allocation9 + $0x15] ss:$8 sm:$0x3] }
  0x73   : > { %v1894_v19 = vld [vmem:[#allocation9 + $0x16] ss:$8 sm:$0x3]  ;;  %v1896_v20 = vld [vmem:[#allocation9 + $0x17] ss:$8 sm:$0x3] }
  0x74   : > { %v1898_v21 = vld [vmem:[#allocation9 + $0x20] ss:$8 sm:$0x3]  ;;  %v1900_v22 = vld [vmem:[#allocation9 + $0x21] ss:$8 sm:$0x3] }
  0x75   : > { %v1902_v23 = vld [vmem:[#allocation9 + $0x22] ss:$8 sm:$0x3]  ;;  %v1904_v24 = vld [vmem:[#allocation9 + $0x23] ss:$8 sm:$0x3] }
  0x76   : > { %v1906_v25 = vld [vmem:[#allocation9 + $0x24] ss:$8 sm:$0x3]  ;;  %v1908_v26 = vld [vmem:[#allocation9 + $0x25] ss:$8 sm:$0x3] }
  0x77   : > { %v1910_v27 = vld [vmem:[#allocation9 + $0x26] ss:$8 sm:$0x3]  ;;  %v1912_v28 = vld [vmem:[#allocation9 + $0x27] ss:$8 sm:$0x3] }
  0x78   : > { %2465 = vst [vmem:[#allocation27_spill] sm:$0xff] %v1910_v27  ;;  %2466 = vst [vmem:[#allocation28_spill] sm:$0xff] %v1912_v28  ;;  %v1914_v29 = vld [vmem:[#allocation9 + $0x30] ss:$8 sm:$0x3]  ;;  %v393_v33 = vld [vmem:[%s1840_s0] sm:$0xff] }
  0x79   : > { %2467 = vst [vmem:[#allocation29_spill] sm:$0xff] %v1914_v29  ;;  %v1916_v30 = vld [vmem:[#allocation9 + $0x31] ss:$8 sm:$0x3]  ;;  %2470 = vst [vmem:[#allocation32_spill] sm:$0xff] %v1923_v32  ;;  %v394_v34 = vld [vmem:[%s1840_s0 + $0x8] sm:$0xff] }
  0x7a   : > { %2468 = vst [vmem:[#allocation30_spill] sm:$0xff] %v1916_v30  ;;  %v1918_v31 = vld [vmem:[#allocation9 + $0x32] ss:$8 sm:$0x3]  ;;  %402 = vst [vmem:[#allocation2 + $0x10] sm:$0xff] %v393_v33  ;;  %v397_v37 = vld [vmem:[%s1840_s0 + $0x20] sm:$0xff] }
  0x7b   : > { %2469 = vst [vmem:[#allocation31_spill] sm:$0xff] %v1918_v31  ;;  %403 = vst [vmem:[#allocation2 + $0x18] sm:$0xff] %v394_v34  ;;  %v398_v38 = vld [vmem:[%s1840_s0 + $0x28] sm:$0xff]  ;;  %v399_v39 = vld [vmem:[%s1840_s0 + $0x30] sm:$0xff]  ;;  %s1935_s16 = scalar_lea.vmem [#allocation11], %s1299_s3  ;;  %s1937_s30 = smov 0  }
  0x7c   : > { %404 = vst [vmem:[#allocation2 + $0x20] sm:$0xff] %v395_v35  ;;  %405 = vst [vmem:[#allocation2 + $0x28] sm:$0xff] %v396_v36  ;;  %v400_v40 = vld [vmem:[%s1840_s0 + $0x38] sm:$0xff] }
  0x7d   : > { %406 = vst [vmem:[#allocation2 + $0x30] sm:$0xff] %v397_v37  ;;  %407 = vst [vmem:[#allocation2 + $0x38] sm:$0xff] %v398_v38 }
  0x7e   : > { %408 = vst [vmem:[#allocation2 + $0x40] sm:$0xff] %v399_v39  ;;  %409 = vst [vmem:[#allocation2 + $0x48] sm:$0xff] %v400_v40 }
  0x7f LB: >> { %v2471_v8 = vld [vmem:[#allocation25_spill] sm:$0xff]  ;;  %v2472_v9 = vld [vmem:[#allocation26_spill] sm:$0xff]  ;;  %v2473_v7 = vld [vmem:[#allocation24_spill] sm:$0xff]  ;;  %s1304_s11 = sshll.u32 %s1630_s30, 4  ;;  %s1639_s9 = smov 32   ;;  %vm568_vm4 = vcmp.lt.s32.totalorder %v1855_v2, 96  ;;  %s1630_s30 = sphi %s1937_s30, %s496_s30  }
  0x80   : >> { %v2474_v5 = vld [vmem:[#allocation22_spill] sm:$0xff]  ;;  %v2475_v32 = vld [vmem:[#allocation32_spill] sm:$0xff]  ;;  %v2476_v6 = vld [vmem:[#allocation23_spill] sm:$0xff]  ;;  %s1945_s14 = scalar_lea.vmem [#allocation2], %s1304_s11  ;;  %s1640_s15 = smov 96   ;;  %vm529_vm5 = vcmp.lt.s32.totalorder %v1855_v2, 32 }
  0x81   : >> { %v2477_v3 = vld [vmem:[#allocation21_spill] sm:$0xff]  ;;  %s1103_s25 = scalar_lea.vmem %s1935_s16, %s1304_s11 [#allocation11]  ;;  %s496_s30 = sadd.s32 1, %s1630_s30  }
  0x82   : >> { %v2098_v40 = vsub.s32 0, %v2477_v3  ;;  %p493_p7 = scmp.ge.s32.totalorder %s496_s30, 4  }
  0x83   : > { %s1324_s26 = sshll.u32 (%p493_p7), %s1618_s21, 10  ;;  %s1123_s24 = sshll.u32 (%p493_p7), %s1935_s16, 4  ;;  %s2358_s24 = int_to_ptr.vmem [resolvable:$true] %s1123_s24 }
  0x84   : >> { %v638_v28 = vrot.slane %v1876_v10, %v2098_v40  ;;  %s2355_s22 = scalar_lea.hbm (%p493_p7), %s2411_s5, %s1324_s26  ;;  %s1107_s8 = scalar_lea.sflag (%p493_p7), [#allocation5], %s1834_s1 }
  0x85   : >> { %v1948_v41 = vld [vmem:[%s1945_s14 + $0x8] sm:$0xff]  ;;  %v1951_v42 = vld [vmem:[%s1945_s14] sm:$0xff]  ;;  %v1990_v51 = vld [vmem:[%s1945_s14 + $0x18] sm:$0xff]  ;;  %s1534_s10 = scalar_lea.vmem (%p493_p7), %s2358_s24, 1024  ;;  %p2491_p11 = scmp.ne.s32.totalorder (%p493_p7), %s2449_s12, 0 }
  0x86   : >> { %590 = vrot.lane.b32.xlu1 %v1948_v41, %s1639_s9  ;;  %588 = vrot.lane.b32.xlu0 %v1951_v42, %s1639_s9  ;;  %v521_v43 = vrot.slane %v1951_v42, 7  ;;  %v522_v44 = vrot.slane %v1948_v41, 7  ;;  %v650_v47 = vrot.slane %v1948_v41, 1  ;;  %v649_v48 = vrot.slane %v1951_v42, 1  ;;  %v1993_v52 = vld [vmem:[%s1945_s14 + $0x10] sm:$0xff]  ;;  %v2040_v61 = vld [vmem:[%s1945_s14 + $0x28] sm:$0xff]  ;;  %p1535_p5 = scmp.ne.s32.totalorder (%p493_p7), %s2358_s24, %s1534_s10 }
  0x87   : >> { %v715_v53 = vrot.slane %v1990_v51, 7  ;;  %v714_v54 = vrot.slane %v1993_v52, 7  ;;  %v841_v57 = vrot.slane %v1990_v51, 1  ;;  %v840_v58 = vrot.slane %v1993_v52, 1  ;;  %2478 = vst [vmem:[#allocation33_spill] sm:$0xff] %v2040_v61  ;;  %v2043_v62 = vld [vmem:[%s1945_s14 + $0x20] sm:$0xff] }
  0x88   : >> { %v1961_v45 = vsel %vm489_vm1, %v521_v43, 0.0  ;;  %v1969_v46 = vsel %vm489_vm1, %v522_v44, 0.0  ;;  %v1983_v49 = vsel %vm490_vm2, %v650_v47, 0.0  ;;  %v1987_v50 = vsel %vm490_vm2, %v649_v48, 0.0  ;;  %2479 = vst [vmem:[#allocation34_spill] sm:$0xff] %v2043_v62  ;;  %p1536_p2 = pnand (%p493_p7), %p1535_p5, %p2491_p11  ;;  %s1641_s17 = smov (%p493_p7), [#allocation11]  }
  0x89   : >> { %v2007_v55 = vsel %vm489_vm1, %v715_v53, 0.0  ;;  %v2011_v56 = vsel %vm489_vm1, %v714_v54, 0.0  ;;  %v2033_v59 = vsel %vm490_vm2, %v841_v57, 0.0  ;;  %v2037_v60 = vsel %vm490_vm2, %v840_v58, 0.0  ;;  %s1538_s3 = sshll.u32 (%p493_p7), %s1641_s17, 4  ;;  %s1539_s3 = int_to_ptr.vmem [resolvable:$false] %s1538_s3 }
  0x8a   : >> { %564 = vrot.lane.b32.xlu1 %v1961_v45, %s1640_s15  ;;  %525 = vrot.lane.b32.xlu0 %v1961_v45, %s1639_s9  ;;  %v912_v63 = vrot.slane %v2040_v61, 7  ;;  %v911_v0 = vrot.slane %v2043_v62, 7  ;;  %v1038_v34 = vrot.slane %v2040_v61, 1  ;;  %v1037_v35 = vrot.slane %v2043_v62, 1  ;;  %p1537_p9 = pneg (%p493_p7), %p1536_p2  ;;  %s1540_s21 = scalar_lea.vmem (%p493_p7), %s1539_s3, 2048 }
  0x8b   : >> { %v2101_v43 = vsub.s32 1, %v2477_v3  ;;  %v553_v44 = vrot.slane %v2476_v6, %v2098_v40  ;;  %v507_v57 = vrot.slane %v2475_v32, %v2098_v40  ;;  %p1541_p10 = scmp.lt.s32.totalorder (%p493_p7), %s2358_s24, %s1539_s3  ;;  %p1542_p1 = scmp.lt.s32.totalorder (%p493_p7), %s1540_s21, %s1534_s10 }
  0x8c   : >> { %v2057_v1 = vsel %vm489_vm1, %v912_v63, 0.0  ;;  %v2061_v33 = vsel %vm489_vm1, %v911_v0, 0.0  ;;  %v2083_v36 = vsel %vm490_vm2, %v1038_v34, 0.0  ;;  %v2087_v37 = vsel %vm490_vm2, %v1037_v35, 0.0 }
  0x8d   : >> { %2480 = vst [vmem:[#allocation35_spill] sm:$0xff] %v2083_v36  ;;  %2481 = vst [vmem:[#allocation36_spill] sm:$0xff] %v2087_v37  ;;  %v557_v47 = vrot.slane %v2476_v6, %v2101_v43  ;;  %v511_v54 = vrot.slane %v2475_v32, %v2101_v43  ;;  %v542_v58 = vrot.slane %v2474_v5, %v2101_v43  ;;  %p1543_p0 = por (%p493_p7), %p1542_p1, %p1541_p10 }
  0x8e   : >> { %566 = vrot.lane.b32.xlu1 %v1969_v46, %s1640_s15  ;;  %527 = vrot.lane.b32.xlu0 %v1969_v46, %s1639_s9  ;;  %v538_v63 = vrot.slane %v2474_v5, %v2098_v40  ;;  %v560_v0 = vmul.f32 %v553_v44, %v1961_v45  ;;  %v604_v45 = vrot.slane %v2471_v8, %v2101_v43 }
  0x8f   : >> { %v561_v34 = vmul.f32 %v557_v47, %v1969_v46  ;;  %v515_v6 = vadd.f32 %v1990_v51, %v511_v54  ;;  %v581_v46 = vrot.slane %v2473_v7, %v2101_v43  ;;  %p1544_p3 = pnand (%p493_p7), %p1543_p0, %p1537_p9 }
  0x92   : >> { %628 = vrot.lane.b32.xlu1 %v1948_v41, %s1640_s15  ;;  %626 = vrot.lane.b32.xlu0 %v1951_v42, %s1640_s15 }
  0x96   : >> { %655 = vrot.lane.b32.xlu1 %v1983_v49, %s1639_s9  ;;  %653 = vrot.lane.b32.xlu0 %v1987_v50, %s1639_s9 }
  0x9a   : >> { %693 = vrot.lane.b32.xlu1 %v1983_v49, %s1640_s15  ;;  %691 = vrot.lane.b32.xlu0 %v1987_v50, %s1640_s15 }
  0x9e   : >> { %720 = vrot.lane.b32.xlu1 %v2007_v55, %s1639_s9  ;;  %718 = vrot.lane.b32.xlu0 %v2011_v56, %s1639_s9 }
  0xa2   : >> { %758 = vrot.lane.b32.xlu1 %v2007_v55, %s1640_s15  ;;  %756 = vrot.lane.b32.xlu0 %v2011_v56, %s1640_s15 }
  0xa6   : >> { %781 = vrot.lane.b32.xlu1 %v1990_v51, %s1639_s9  ;;  %779 = vrot.lane.b32.xlu0 %v1993_v52, %s1639_s9 }
  0xaa   : >> { %819 = vrot.lane.b32.xlu1 %v1990_v51, %s1640_s15  ;;  %817 = vrot.lane.b32.xlu0 %v1993_v52, %s1640_s15 }
  0xae   : >> { %846 = vrot.lane.b32.xlu1 %v2033_v59, %s1639_s9  ;;  %844 = vrot.lane.b32.xlu0 %v2037_v60, %s1639_s9 }
  0xb2   : >> { %884 = vrot.lane.b32.xlu1 %v2033_v59, %s1640_s15  ;;  %882 = vrot.lane.b32.xlu0 %v2037_v60, %s1640_s15 }
  0xb6   : >> { %917 = vrot.lane.b32.xlu1 %v2057_v1, %s1639_s9  ;;  %915 = vrot.lane.b32.xlu0 %v2061_v33, %s1639_s9 }
  0xba   : >> { %955 = vrot.lane.b32.xlu1 %v2057_v1, %s1640_s15  ;;  %953 = vrot.lane.b32.xlu0 %v2061_v33, %s1640_s15 }
  0xbe   : >> { %978 = vrot.lane.b32.xlu1 %v2040_v61, %s1639_s9  ;;  %976 = vrot.lane.b32.xlu0 %v2043_v62, %s1639_s9 }
  0xc2   : >> { %1016 = vrot.lane.b32.xlu1 %v2040_v61, %s1640_s15  ;;  %1014 = vrot.lane.b32.xlu0 %v2043_v62, %s1640_s15  ;;  %v615_v62 = vrot.slane %v2472_v9, %v2098_v40 }
  0xc6   : >> { %1043 = vrot.lane.b32.xlu1 %v2083_v36, %s1639_s9  ;;  %1041 = vrot.lane.b32.xlu0 %v2087_v37, %s1639_s9 }
  0xca   : >> { %1081 = vrot.lane.b32.xlu1 %v2083_v36, %s1640_s15  ;;  %1079 = vrot.lane.b32.xlu0 %v2087_v37, %s1640_s15  ;;  %v514_v37 = vadd.f32 %v1993_v52, %v507_v57  ;;  %v577_v57 = vrot.slane %v2473_v7, %v2098_v40  ;;  %v600_v7 = vrot.slane %v2471_v8, %v2098_v40 }
  0xcb   : >> { %v642_v8 = vrot.slane %v1876_v10, %v2101_v43 }
  0xf8   : >> { %v591_v38 = vpop.permute.xlu1 %590  ;;  %v589_v39 = vpop.permute.xlu0 %588 }
  0xf9   : >> { %v593_v54 = vsel %vm529_vm5, %v591_v38, %v589_v39 }
  0xfc   : >> { %v565_v48 = vpop.permute.xlu1 %564  ;;  %v526_v53 = vpop.permute.xlu0 %525 }
 0x100   : >> { %v567_v35 = vpop.permute.xlu1 %566  ;;  %v528_v3 = vpop.permute.xlu0 %527 }
 0x101   : >> { %v570_v32 = vsel %vm568_vm4, %v567_v35, %v565_v48  ;;  %v530_v31 = vsel %vm529_vm5, %v526_v53, %v528_v3  ;;  %v531_v5 = vsel %vm529_vm5, %v528_v3, %v526_v53  ;;  %v569_v53 = vsel %vm568_vm4, %v565_v48, %v567_v35 }
 0x102   : >> { %v532_v44 = vsel %vm485_vm0, %v531_v5, 0.0  ;;  %v546_v47 = vmul.f32 %v542_v58, %v530_v31  ;;  %v572_v36 = vsel %vm488_vm3, %v570_v32, 0.0  ;;  %v619_v5 = vrot.slane %v2472_v9, %v2101_v43 }
 0x103   : >> { %v545_v3 = vmul.f32 %v538_v63, %v532_v44  ;;  %v684_v58 = vrot.slane %v1880_v12, %v2101_v43  ;;  %v592_v32 = vsel %vm529_vm5, %v589_v39, %v591_v38  ;;  %v585_v48 = vmul.f32 %v581_v46, %v572_v36 }
 0x104   : >> { %v548_v29 = vadd.f32 %v546_v47, %v515_v6  ;;  %v629_v30 = vpop.permute.xlu1 %628  ;;  %v627_v31 = vpop.permute.xlu0 %626  ;;  %v594_v6 = vsel %vm485_vm0, %v593_v54, 0.0  ;;  %v584_v47 = vmul.f32 %v577_v57, %v569_v53  ;;  %v608_v61 = vmul.f32 %v604_v45, %v592_v32 }
 0x105   : >> { %v547_v63 = vadd.f32 %v545_v3, %v514_v37  ;;  %v631_v44 = vsel %vm568_vm4, %v629_v30, %v627_v31  ;;  %v622_v37 = vmul.f32 %v615_v62, %v1951_v42  ;;  %v623_v38 = vmul.f32 %v619_v5, %v1948_v41 }
 0x106   : >> { %v563_v35 = vadd.f32 %v561_v34, %v548_v29  ;;  %v607_v29 = vmul.f32 %v600_v7, %v594_v6  ;;  %v633_v46 = vsel %vm488_vm3, %v631_v44, 0.0  ;;  %v680_v54 = vrot.slane %v1880_v12, %v2098_v40 }
 0x107   : >> { %v562_v9 = vadd.f32 %v560_v0, %v547_v63  ;;  %v630_v45 = vsel %vm568_vm4, %v627_v31, %v629_v30  ;;  %v669_v41 = vrot.slane %v1878_v11, %v2101_v43  ;;  %v665_v7 = vrot.slane %v1878_v11, %v2098_v40 }
 0x108   : >> { %v587_v27 = vadd.f32 %v585_v48, %v563_v35  ;;  %v656_v39 = vpop.permute.xlu1 %655  ;;  %v654_v36 = vpop.permute.xlu0 %653  ;;  %v749_v62 = vrot.slane %v1886_v15, %v2101_v43  ;;  %v646_v53 = vmul.f32 %v642_v8, %v633_v46  ;;  %v688_v5 = vmul.f32 %v684_v58, %v1983_v49 }
 0x109   : >> { %v586_v34 = vadd.f32 %v584_v47, %v562_v9  ;;  %v658_v0 = vsel %vm529_vm5, %v656_v39, %v654_v36  ;;  %v657_v9 = vsel %vm529_vm5, %v654_v36, %v656_v39  ;;  %v645_v32 = vmul.f32 %v638_v28, %v630_v45 }
 0x10a   : >> { %v610_v57 = vadd.f32 %v608_v61, %v587_v27  ;;  %v659_v27 = vsel %vm485_vm0, %v658_v0, 0.0  ;;  %v687_v6 = vmul.f32 %v680_v54, %v1987_v50  ;;  %v673_v35 = vmul.f32 %v669_v41, %v657_v9 }
 0x10b   : >> { %v609_v42 = vadd.f32 %v607_v29, %v586_v34  ;;  %v707_v44 = vrot.slane %v1882_v13, %v2101_v43  ;;  %v672_v47 = vmul.f32 %v665_v7, %v659_v27  ;;  %v745_v28 = vrot.slane %v1886_v15, %v2098_v40 }
 0x10c   : >> { %v625_v3 = vadd.f32 %v623_v38, %v610_v57  ;;  %v694_v61 = vpop.permute.xlu1 %693  ;;  %v692_v30 = vpop.permute.xlu0 %691  ;;  %v703_v38 = vrot.slane %v1882_v13, %v2098_v40  ;;  %v734_v39 = vrot.slane %v1884_v14, %v2101_v43  ;;  %v730_v34 = vrot.slane %v1884_v14, %v2098_v40 }
 0x10d   : >> { %v624_v31 = vadd.f32 %v622_v37, %v609_v42  ;;  %v696_v63 = vsel %vm568_vm4, %v694_v61, %v692_v30  ;;  %v695_v50 = vsel %vm568_vm4, %v692_v30, %v694_v61  ;;  %v753_v41 = vmul.f32 %v749_v62, %v2007_v55 }
 0x10e   : >> { %v648_v48 = vadd.f32 %v646_v53, %v625_v3  ;;  %v698_v49 = vsel %vm488_vm3, %v696_v63, 0.0  ;;  %v710_v7 = vmul.f32 %v703_v38, %v695_v50  ;;  %v772_v9 = vrot.slane %v1888_v16, %v2101_v43 }
 0x10f   : >> { %v647_v8 = vadd.f32 %v645_v32, %v624_v31  ;;  %v711_v57 = vmul.f32 %v707_v44, %v698_v49  ;;  %v752_v3 = vmul.f32 %v745_v28, %v2011_v56  ;;  %v768_v63 = vrot.slane %v1888_v16, %v2098_v40 }
 0x110   : >> { %v675_v58 = vadd.f32 %v673_v35, %v648_v48  ;;  %v721_v37 = vpop.permute.xlu1 %720  ;;  %v719_v36 = vpop.permute.xlu0 %718  ;;  %v795_v48 = vrot.slane %v1890_v17, %v2101_v43 }
 0x111   : >> { %v674_v29 = vadd.f32 %v672_v47, %v647_v8  ;;  %v722_v46 = vsel %vm529_vm5, %v719_v36, %v721_v37  ;;  %v723_v0 = vsel %vm529_vm5, %v721_v37, %v719_v36  ;;  %v791_v8 = vrot.slane %v1890_v17, %v2098_v40 }
 0x112   : >> { %v690_v54 = vadd.f32 %v688_v5, %v675_v58  ;;  %v724_v45 = vsel %vm485_vm0, %v723_v0, 0.0  ;;  %v738_v27 = vmul.f32 %v734_v39, %v722_v46  ;;  %v810_v5 = vrot.slane %v1892_v18, %v2101_v43 }
 0x113   : >> { %v689_v42 = vadd.f32 %v687_v6, %v674_v29  ;;  %v737_v32 = vmul.f32 %v730_v34, %v724_v45  ;;  %v806_v47 = vrot.slane %v1892_v18, %v2098_v40  ;;  %v829_v0 = vrot.slane %v1894_v19, %v2098_v40 }
 0x114   : >> { %v713_v53 = vadd.f32 %v711_v57, %v690_v54  ;;  %v759_v61 = vpop.permute.xlu1 %758  ;;  %v757_v30 = vpop.permute.xlu0 %756  ;;  %v814_v28 = vmul.f32 %v1990_v51, %v810_v5  ;;  %v833_v45 = vrot.slane %v1894_v19, %v2101_v43  ;;  %v860_v5 = vrot.slane %v1896_v20, %v2101_v43 }
 0x115   : >> { %v712_v31 = vadd.f32 %v710_v7, %v689_v42  ;;  %v761_v55 = vsel %vm568_vm4, %v759_v61, %v757_v30  ;;  %v760_v6 = vsel %vm568_vm4, %v757_v30, %v759_v61  ;;  %v813_v51 = vmul.f32 %v1993_v52, %v806_v47 }
 0x116   : >> { %v740_v62 = vadd.f32 %v738_v27, %v713_v53  ;;  %v763_v56 = vsel %vm488_vm3, %v761_v55, 0.0  ;;  %v775_v37 = vmul.f32 %v768_v63, %v760_v6  ;;  %v871_v61 = vrot.slane %v1898_v21, %v2098_v40 }
 0x117   : >> { %v739_v35 = vadd.f32 %v737_v32, %v712_v31  ;;  %v776_v44 = vmul.f32 %v772_v9, %v763_v56  ;;  %v875_v9 = vrot.slane %v1898_v21, %v2101_v43  ;;  %v856_v55 = vrot.slane %v1896_v20, %v2098_v40 }
 0x118   : >> { %v755_v38 = vadd.f32 %v753_v41, %v740_v62  ;;  %v782_v49 = vpop.permute.xlu1 %781  ;;  %v780_v58 = vpop.permute.xlu0 %779 }
 0x119   : >> { %v754_v50 = vadd.f32 %v752_v3, %v739_v35  ;;  %v783_v39 = vsel %vm529_vm5, %v780_v58, %v782_v49  ;;  %v784_v36 = vsel %vm529_vm5, %v782_v49, %v780_v58  ;;  %v894_v58 = vrot.slane %v1900_v22, %v2098_v40 }
 0x11a   : >> { %v778_v29 = vadd.f32 %v776_v44, %v755_v38  ;;  %v785_v34 = vsel %vm485_vm0, %v784_v36, 0.0  ;;  %v799_v46 = vmul.f32 %v795_v48, %v783_v39  ;;  %v879_v44 = vmul.f32 %v875_v9, %v2033_v59 }
 0x11b   : >> { %v777_v54 = vadd.f32 %v775_v37, %v754_v50  ;;  %v798_v57 = vmul.f32 %v791_v8, %v785_v34  ;;  %v878_v8 = vmul.f32 %v871_v61, %v2037_v60  ;;  %v898_v50 = vrot.slane %v1900_v22, %v2101_v43 }
 0x11c   : >> { %v801_v41 = vadd.f32 %v799_v46, %v778_v29  ;;  %v820_v42 = vpop.permute.xlu1 %819  ;;  %v818_v7 = vpop.permute.xlu0 %817  ;;  %v946_v59 = vrot.slane %v1904_v24, %v2101_v43  ;;  %v942_v46 = vrot.slane %v1904_v24, %v2098_v40 }
 0x11d   : >> { %v800_v3 = vadd.f32 %v798_v57, %v777_v54  ;;  %v821_v53 = vsel %vm568_vm4, %v818_v7, %v820_v42  ;;  %v822_v27 = vsel %vm568_vm4, %v820_v42, %v818_v7  ;;  %v931_v57 = vrot.slane %v1902_v23, %v2101_v43 }
 0x11e   : >> { %v816_v52 = vadd.f32 %v814_v28, %v801_v41  ;;  %v824_v30 = vsel %vm488_vm3, %v822_v27, 0.0  ;;  %v836_v32 = vmul.f32 %v829_v0, %v821_v53  ;;  %v927_v42 = vrot.slane %v1902_v23, %v2098_v40 }
 0x11f   : >> { %v815_v31 = vadd.f32 %v813_v51, %v800_v3  ;;  %v837_v63 = vmul.f32 %v833_v45, %v824_v30  ;;  %v950_v61 = vmul.f32 %v946_v59, %v2057_v1 }
 0x120   : >> { %v847_v62 = vpop.permute.xlu1 %846  ;;  %v845_v6 = vpop.permute.xlu0 %844 }
 0x121   : >> { %v839_v56 = vadd.f32 %v837_v63, %v816_v52  ;;  %v848_v48 = vsel %vm529_vm5, %v845_v6, %v847_v62  ;;  %v849_v35 = vsel %vm529_vm5, %v847_v62, %v845_v6  ;;  %v838_v49 = vadd.f32 %v836_v32, %v815_v31 }
 0x122   : >> { %v850_v47 = vsel %vm485_vm0, %v849_v35, 0.0  ;;  %v864_v38 = vmul.f32 %v860_v5, %v848_v48  ;;  %v949_v52 = vmul.f32 %v942_v46, %v2061_v33  ;;  %v965_v63 = vrot.slane %v1906_v25, %v2098_v40 }
 0x123   : >> { %v863_v28 = vmul.f32 %v856_v55, %v850_v47  ;;  %v969_v55 = vrot.slane %v1906_v25, %v2101_v43  ;;  %v992_v35 = vrot.slane %v1908_v26, %v2101_v43  ;;  %v988_v47 = vrot.slane %v1908_v26, %v2098_v40 }
 0x124   : >> { %v866_v37 = vadd.f32 %v864_v38, %v839_v56  ;;  %v885_v39 = vpop.permute.xlu1 %884  ;;  %v883_v36 = vpop.permute.xlu0 %882  ;;  %v2482_v38 = vld [vmem:[#allocation27_spill] sm:$0xff] }
 0x125   : >> { %v865_v29 = vadd.f32 %v863_v28, %v838_v49  ;;  %v886_v60 = vsel %vm568_vm4, %v883_v36, %v885_v39  ;;  %v887_v34 = vsel %vm568_vm4, %v885_v39, %v883_v36  ;;  %v1007_v49 = vrot.slane %v2482_v38, %v2101_v43 }
 0x126   : >> { %v881_v0 = vadd.f32 %v879_v44, %v866_v37  ;;  %v889_v54 = vsel %vm488_vm3, %v887_v34, 0.0  ;;  %v901_v45 = vmul.f32 %v894_v58, %v886_v60  ;;  %v1003_v37 = vrot.slane %v2482_v38, %v2098_v40  ;;  %v2483_v34 = vld [vmem:[#allocation33_spill] sm:$0xff] }
 0x127   : >> { %v880_v51 = vadd.f32 %v878_v8, %v865_v29  ;;  %v902_v41 = vmul.f32 %v898_v50, %v889_v54  ;;  %v1011_v46 = vmul.f32 %v2483_v34, %v1007_v49 }
 0x128   : >> { %v918_v7 = vpop.permute.xlu1 %917  ;;  %v916_v9 = vpop.permute.xlu0 %915 }
 0x129   : >> { %v904_v3 = vadd.f32 %v902_v41, %v881_v0  ;;  %v919_v53 = vsel %vm529_vm5, %v916_v9, %v918_v7  ;;  %v920_v27 = vsel %vm529_vm5, %v918_v7, %v916_v9  ;;  %v903_v31 = vadd.f32 %v901_v45, %v880_v51 }
 0x12a   : >> { %v921_v30 = vsel %vm485_vm0, %v920_v27, 0.0  ;;  %v935_v5 = vmul.f32 %v931_v57, %v919_v53  ;;  %v2484_v57 = vld [vmem:[#allocation28_spill] sm:$0xff] }
 0x12b   : >> { %v934_v32 = vmul.f32 %v927_v42, %v921_v30  ;;  %v1026_v51 = vrot.slane %v2484_v57, %v2098_v40  ;;  %v2485_v42 = vld [vmem:[#allocation34_spill] sm:$0xff]  ;;  %v1030_v9 = vrot.slane %v2484_v57, %v2101_v43 }
 0x12c   : >> { %v937_v62 = vadd.f32 %v935_v5, %v904_v3  ;;  %v956_v6 = vpop.permute.xlu1 %955  ;;  %v954_v56 = vpop.permute.xlu0 %953  ;;  %v1010_v7 = vmul.f32 %v2485_v42, %v1003_v37 }
 0x12d   : >> { %v936_v48 = vadd.f32 %v934_v32, %v903_v31  ;;  %v957_v1 = vsel %vm568_vm4, %v954_v56, %v956_v6  ;;  %v958_v33 = vsel %vm568_vm4, %v956_v6, %v954_v56 }
 0x12e   : >> { %v952_v44 = vadd.f32 %v950_v61, %v937_v62  ;;  %v960_v8 = vsel %vm488_vm3, %v958_v33, 0.0  ;;  %v972_v58 = vmul.f32 %v965_v63, %v957_v1  ;;  %v2486_v61 = vld [vmem:[#allocation30_spill] sm:$0xff]  ;;  %v2487_v62 = vld [vmem:[#allocation29_spill] sm:$0xff] }
 0x12f   : >> { %v951_v28 = vadd.f32 %v949_v52, %v936_v48  ;;  %v973_v50 = vmul.f32 %v969_v55, %v960_v8  ;;  %v1072_v52 = vrot.slane %v2486_v61, %v2101_v43  ;;  %v1068_v32 = vrot.slane %v2486_v61, %v2098_v40 }
 0x130   : >> { %v979_v39 = vpop.permute.xlu1 %978  ;;  %v977_v36 = vpop.permute.xlu0 %976  ;;  %v1057_v6 = vrot.slane %v2487_v62, %v2101_v43  ;;  %v1053_v33 = vrot.slane %v2487_v62, %v2098_v40 }
 0x131   : >> { %v975_v59 = vadd.f32 %v973_v50, %v952_v44  ;;  %v980_v29 = vsel %vm529_vm5, %v977_v36, %v979_v39  ;;  %v981_v60 = vsel %vm529_vm5, %v979_v39, %v977_v36  ;;  %v974_v45 = vadd.f32 %v972_v58, %v951_v28  ;;  %v2488_v28 = vld [vmem:[#allocation35_spill] sm:$0xff] }
 0x132   : >> { %v982_v0 = vsel %vm485_vm0, %v981_v60, 0.0  ;;  %v996_v54 = vmul.f32 %v992_v35, %v980_v29  ;;  %v1076_v58 = vmul.f32 %v1072_v52, %v2488_v28  ;;  %v2489_v39 = vld [vmem:[#allocation31_spill] sm:$0xff] }
 0x133   : >> { %v995_v41 = vmul.f32 %v988_v47, %v982_v0  ;;  %v1091_v36 = vrot.slane %v2489_v39, %v2098_v40 }
 0x134   : >> { %v998_v3 = vadd.f32 %v996_v54, %v975_v59  ;;  %v1017_v53 = vpop.permute.xlu1 %1016  ;;  %v1015_v27 = vpop.permute.xlu0 %1014  ;;  %v2490_v59 = vld [vmem:[#allocation36_spill] sm:$0xff] }
 0x135   : >> { %v997_v30 = vadd.f32 %v995_v41, %v974_v45  ;;  %v1018_v5 = vsel %vm568_vm4, %v1015_v27, %v1017_v53  ;;  %v1019_v31 = vsel %vm568_vm4, %v1017_v53, %v1015_v27  ;;  %v1075_v29 = vmul.f32 %v1068_v32, %v2490_v59 }
 0x136   : >> { %v1013_v63 = vadd.f32 %v1011_v46, %v998_v3  ;;  %v1021_v55 = vsel %vm488_vm3, %v1019_v31, 0.0  ;;  %v1033_v48 = vmul.f32 %v1026_v51, %v1018_v5  ;;  %v1095_v46 = vrot.slane %v2489_v39, %v2101_v43 }
 0x137   : >> { %v1012_v56 = vadd.f32 %v1010_v7, %v997_v30  ;;  %v1034_v1 = vmul.f32 %v1030_v9, %v1021_v55 }
 0x138   : >> { %v1044_v35 = vpop.permute.xlu1 %1043  ;;  %v1042_v44 = vpop.permute.xlu0 %1041 }
 0x139   : >> { %v1036_v8 = vadd.f32 %v1034_v1, %v1013_v63  ;;  %v1045_v47 = vsel %vm529_vm5, %v1042_v44, %v1044_v35  ;;  %v1046_v49 = vsel %vm529_vm5, %v1044_v35, %v1042_v44  ;;  %v1035_v60 = vadd.f32 %v1033_v48, %v1012_v56 }
 0x13a   : >> { %v1047_v50 = vsel %vm485_vm0, %v1046_v49, 0.0  ;;  %v1061_v37 = vmul.f32 %v1057_v6, %v1045_v47 }
 0x13b   : >> { %v1060_v34 = vmul.f32 %v1053_v33, %v1047_v50 }
 0x13c   : >> { %v1063_v0 = vadd.f32 %v1061_v37, %v1036_v8  ;;  %v1082_v54 = vpop.permute.xlu1 %1081  ;;  %v1080_v51 = vpop.permute.xlu0 %1079 }
 0x13d   : >> { %v1062_v45 = vadd.f32 %v1060_v34, %v1035_v60  ;;  %v1083_v41 = vsel %vm568_vm4, %v1080_v51, %v1082_v54  ;;  %v1084_v42 = vsel %vm568_vm4, %v1082_v54, %v1080_v51 }
 0x13e   : >> { %v1078_v40 = vadd.f32 %v1076_v58, %v1063_v0  ;;  %v1086_v7 = vsel %vm488_vm3, %v1084_v42, 0.0  ;;  %v1098_v9 = vmul.f32 %v1091_v36, %v1083_v41 }
 0x13f   : >> { %v1077_v3 = vadd.f32 %v1075_v29, %v1062_v45  ;;  %v1099_v53 = vmul.f32 %v1095_v46, %v1086_v7  ;;  %495 = sbr.rel (!%p493_p7) target bundleno = 127 (0x7f), region = 152 }
 0x141   : >> { %v1100_v43 = vadd.f32 %v1098_v9, %v1077_v3  ;;  %v1101_v27 = vadd.f32 %v1099_v53, %v1078_v40 }
 0x143   : >> { %1104 = vst [vmem:[%s1103_s25] sm:$0xff] %v1100_v43  ;;  %1105 = vst [vmem:[%s1103_s25 + $0x8] sm:$0xff] %v1101_v27 }
 0x144   : > { %1547 = shalt.err (!%p1544_p3)
}
 0x145   : > { %s1548_s27 = scalar_lea.hbm %s2355_s22, 1024  ;;  %s1552_s23 = scalar_lea.hbm %s2411_s5, 2048 }
 0x146   : > { %p1549_p8 = scmp.ne.s32.totalorder %s2355_s22, %s1548_s27  ;;  %p1553_p4 = scmp.lt.s32.totalorder %s2355_s22, %s2411_s5 }
 0x147   : > { %p1554_p6 = scmp.lt.s32.totalorder %s1552_s23, %s1548_s27 }
 0x148   : > { %p1550_p13 = pnand %p1549_p8, %p2491_p11 }
 0x149   : > { %p1555_p7 = por %p1554_p6, %p1553_p4 }
 0x14a   : > { %p1551_p12 = pneg %p1550_p13 }
 0x14c   : > { %p1556_p5 = pnand %p1555_p7, %p1551_p12 }
 0x14e   : > { %1559 = shalt.err (!%p1556_p5)
}
 0x14f   : > { %s1642_s16 = smov 256   ;;  %s1643_s30 = smov 16  }
 0x150   : > { %1336 = dma.vmem_to_hbm [thread:$0]  (%p2491_p11), %s2358_s24, 1024, %s2355_s22, %s1107_s8, %s1642_s16, %s1642_s16, %s1643_s30  }
 0x151 PF: > { %s2492_s11 = sld [smem:[#allocation18_spill]]  ;;  %s1138_s14 = sand.u32 1, %s1606_s18  }
 0x152   : > { %p2493_p2 = scmp.ne.s32.totalorder %s2450_s13, 0  ;;  %s1139_s9 = scalar_lea.sflag [#allocation5], %s1138_s14 }
 0x157   : > { %p2494_p9 = scmp.ge.s32.totalorder %s2492_s11, 2 }
 0x159   : > { %p1353_p10 = pnand %p2494_p9, %p2493_p2 }
 0x15b   : > { %p1354_p1 = pneg %p1353_p10 }
 0x15d   : > { %1601 = dma.done.wait (%p1354_p1), %s1139_s9, 1024  }
 0x15e   : > { %1603 = vsyncadd (%p1354_p1), %s1139_s9, 4294966272  ;;  %s25_s23 = sadd.s32 1, %s2492_s11   ;;  %s2495_s15 = sld [smem:[#allocation16_spill]] }
 0x15f   : > { %p22_p0 = scmp.ge.s32.totalorder %s25_s23, 4   ;;  %s2496_s20 = sld [smem:[#allocation20_spill]] }
 0x160   : > { %s2497_s21 = sld [smem:[#allocation17_spill]]  ;;  %s2499_s18 = smov %s1610_s19 }
 0x161   : > { %s2498_s22 = sld [smem:[#allocation19_spill]]  ;;  %24 = sbr.rel (!%p22_p0) target bundleno = 13 (0xd), region = 163 }
 0x164   : > { %s2500_s19 = smov %s2495_s15 }
 0x166   :  { %1144 = vsyncpa [#allocation4], 1 }
 0x167   :  { %1146 = vsyncpa [#allocation4 + $0x1], 1 }
 0x168   :  { %1147 = vsyncpa [#allocation7], 1 }
 0x169   :  { %1149 = vsyncpa [#allocation7 + $0x1], 1 }
 0x16a   :  { %1150 = vsyncpa [#allocation10], 1 }
 0x16b   :  { %1151 = vsyncpa [#allocation5], 1 }
 0x16c   :  { %1153 = vsyncpa [#allocation5 + $0x1], 1 }

</bundles_post_ra>
